<compile_context>
chip_gen: v6e
topology: v6e:2x2x1
jax: 0.10.0
libtpu: 0.0.40
codegen_flags: <defaults>
</compile_context>

<pallas_src>
from functools import partial

import jax
import jax.numpy as jnp
from jax import lax
from jax.experimental import pallas as pl
from jax.experimental.pallas import tpu as pltpu

EPS = 1e-5
_LANE = 128                     # output channels padded to a lane multiple


def _round_up(x, m):
    return (x + m - 1) // m * m


# ------------------------- per-generation tile budgets -----------------------

def _generation_caps():
    kind = ""
    try:
        kind = jax.devices()[0].device_kind.lower()
    except Exception:
        pass
    if "v5" in kind or "v6" in kind:
        # v5e / v6e: 128 MiB physical VMEM -> large tiles, ~100 MiB scoped cap.
        return dict(tm_max=1024, tm2_max=4096,
                    work_budget=80 * 2 ** 20, vmem_cap=100 * 2 ** 20)
    # v7x has only 64 MiB VMEM per TensorCore; unknown chips stay conservative.
    return dict(tm_max=512, tm2_max=2048,
                work_budget=36 * 2 ** 20, vmem_cap=48 * 2 ** 20)


_CAPS = _generation_caps()
_TM_MAX = _CAPS["tm_max"]        # pass-1 row-tile cap (multiple of 32)
_TM2_MAX = _CAPS["tm2_max"]      # pass-2 row-tile cap (elementwise, HBM-bound)
_WORK_BUDGET = _CAPS["work_budget"]
_VMEM_CAP = _CAPS["vmem_cap"]
_VMEM_DEFAULT = 12 * 2 ** 20     # only raise vmem_limit_bytes above this


# ------------------------------ geometry helpers -----------------------------

def _pass1_footprint(tm, tk, c_pad):
    """Double-buffered bf16 patch tile + double-buffered bf16 weight tile +
    f32 accumulator scratch + double-buffered bf16 output + f32 stats tiles."""
    return (2 * tm * tk * 2 + 2 * tk * c_pad * 2 + tm * c_pad * 4
            + 2 * tm * c_pad * 2 + 2 * 8 * c_pad * 4)


def _pass2_footprint(tm2, c_pad, has_skip, out_bytes):
    return (2 * tm2 * c_pad * 2 + (2 * tm2 * c_pad * 4 if has_skip else 0)
            + 2 * tm2 * c_pad * out_bytes + 4 * c_pad * 4)


def _m_geom(m):
    """Pass-1 row tile (multiple of 32 for packed bf16 sublanes) and padded M.
    Pure function of M so the residual add always sees matching padded shapes."""
    tm = min(_TM_MAX, _round_up(m, 32))
    return tm, _round_up(m, tm)


def _k_geom(k, c_pad):
    """Contraction (K) padding / tiling.

    Prefer a single K tile: K is padded only to a multiple of 16 (no 512
    round-up waste) and the whole (K_pad, C_pad) bf16 weight is then fetched
    once and stays resident in VMEM across all M tiles (its block index never
    changes).  Only when that working set exceeds the per-generation VMEM
    budget is K split into the fewest 128-aligned chunks that fit."""
    k1 = _round_up(k, 16)
    if _pass1_footprint(_TM_MAX, k1, c_pad) <= _WORK_BUDGET:
        return k1, k1, 1
    n_k = 2
    while True:
        tk = _round_up(-(-k // n_k), _LANE)
        if tk <= _LANE or _pass1_footprint(_TM_MAX, tk, c_pad) <= _WORK_BUDGET:
            return tk * n_k, tk, n_k
        n_k += 1


def _m2_tile(m_pad, tm, c_pad, has_skip, out_bytes):
    """Pass-2 row tile: as large as the VMEM budget allows (HBM-bound pass;
    small tiles only reach ~30-60% of the HBM roofline)."""
    r = max(1, min(m_pad // tm, max(1, _TM2_MAX // tm)))
    while r > 1 and (m_pad % (r * tm) != 0 or
                     _pass2_footprint(r * tm, c_pad, has_skip, out_bytes)
                     > _WORK_BUDGET):
        r -= 1
    return r * tm


def _mosaic_params(dims, footprint):
    limit = None
    if footprint > _VMEM_DEFAULT:
        limit = int(min(_VMEM_CAP, footprint + footprint // 4))
    return pltpu.CompilerParams(dimension_semantics=dims,
                                vmem_limit_bytes=limit)


# ------------------------------- Pallas kernels ------------------------------

def _conv_stats_kernel(p_ref, w_ref, o_ref, stats_ref, acc_ref):
    """Pass 1: bf16 MXU matmul tile with f32 accumulation (P3 accumulator
    pattern), bf16 store, plus per-M-tile BatchNorm partial statistics
    (channel sum / sum-of-squares).  Grid = (M tiles [parallel], K [arbitrary])."""
    k = pl.program_id(1)

    @pl.when(k == 0)
    def _init():
        acc_ref[...] = jnp.zeros_like(acc_ref)

    acc_ref[...] += jnp.dot(p_ref[...], w_ref[...],
                            preferred_element_type=jnp.float32)

    @pl.when(k == pl.num_programs(1) - 1)
    def _finalize():
        conv = acc_ref[...]
        o_ref[...] = conv.astype(o_ref.dtype)          # bf16 HBM round-trip
        s = jnp.sum(conv, axis=0, keepdims=True)       # (1, C_pad)
        ss = jnp.sum(conv * conv, axis=0, keepdims=True)
        # Stats block is (8, C_pad) sublane-aligned: row 0 = sum, row 1 = sumsq.
        row = lax.broadcasted_iota(jnp.int32, (8, conv.shape[1]), 0)
        stats_ref[0] = jnp.where(row == 0, s, 0.0) + jnp.where(row == 1, ss, 0.0)


def _bn_relu_kernel(c_ref, scale_ref, shift_ref, o_ref):
    """Pass 2: y = relu(conv * scale + shift), lane-dense (tm2, C_pad) tiles."""
    y = c_ref[...].astype(jnp.float32) * scale_ref[...] + shift_ref[...]
    o_ref[...] = jnp.maximum(y, 0.0).astype(o_ref.dtype)


def _bn_relu_add_kernel(c_ref, scale_ref, shift_ref, skip_ref, o_ref):
    """Pass 2 (last conv): relu(conv * scale + shift) + skip (residual add)."""
    y = c_ref[...].astype(jnp.float32) * scale_ref[...] + shift_ref[...]
    o_ref[...] = (jnp.maximum(y, 0.0) + skip_ref[...]).astype(o_ref.dtype)


# -------------------------- fused conv + BN + ReLU ---------------------------

def fused_conv_bn_relu(patches, w_mat, gamma_pad, beta_pad, *, skip=None,
                       out_dtype=jnp.float32):
    """Conv (as matmul) + training-mode BatchNorm + ReLU (+ residual add).

    patches:   (M, K) activation patches (bf16 or castable; M/K zero-padded here)
    w_mat:     (K_pad, C_pad) bf16 weights (prepared once in prepare_params)
    gamma/beta:(C_pad,) f32 BN affine, zero-padded
    skip:      optional (M_pad, C_pad) f32 tensor added after the ReLU
    returns:   (M_pad, C_pad) tensor of dtype `out_dtype`
    """
    M, K = patches.shape
    C_pad = w_mat.shape[1]
    tm, M_pad = _m_geom(M)
    K_pad, tk, n_k = _k_geom(K, C_pad)
    assert w_mat.shape == (K_pad, C_pad), (w_mat.shape, (K_pad, C_pad))
    n_m = M_pad // tm

    p = patches.astype(jnp.bfloat16)
    if (M_pad, K_pad) != (M, K):
        # Zero padding: padded rows/features contribute exactly 0 to the conv
        # and to the BN statistics (which are divided by the *real* M below).
        p = jnp.pad(p, ((0, M_pad - M), (0, K_pad - K)))

    # ---- pass 1: tiled bf16 matmul + per-tile BN partial statistics ---------
    conv_out, stats = pl.pallas_call(
        _conv_stats_kernel,
        grid=(n_m, n_k),
        in_specs=[
            pl.BlockSpec((tm, tk), lambda i, k: (i, k)),
            # n_k == 1 (the common case): block index is always (0, 0), so the
            # whole weight is DMA'd once and stays resident across all M tiles.
            pl.BlockSpec((tk, C_pad), lambda i, k: (k, 0)),
        ],
        out_specs=(
            pl.BlockSpec((tm, C_pad), lambda i, k: (i, 0)),
            pl.BlockSpec((1, 8, C_pad), lambda i, k: (i, 0, 0)),
        ),
        out_shape=(
            jax.ShapeDtypeStruct((M_pad, C_pad), jnp.bfloat16),
            jax.ShapeDtypeStruct((n_m, 8, C_pad), jnp.float32),
        ),
        scratch_shapes=[pltpu.VMEM((tm, C_pad), jnp.float32)],
        compiler_params=_mosaic_params(("parallel", "arbitrary"),
                                       _pass1_footprint(tm, tk, C_pad)),
        cost_estimate=pl.CostEstimate(
            flops=2 * M_pad * K_pad * C_pad,
            transcendentals=0,
            bytes_accessed=(M_pad * K_pad * 2
                            + (1 if n_k == 1 else n_m) * K_pad * C_pad * 2
                            + M_pad * C_pad * 2 + n_m * 8 * C_pad * 4)),
    )(p, w_mat)

    # ---- tiny global stat reduction; fold BN into per-channel scale/shift ---
    s_tot = jnp.sum(stats[:, 0, :], axis=0)           # (C_pad,)
    ss_tot = jnp.sum(stats[:, 1, :], axis=0)          # (C_pad,)
    mean = s_tot / M                                   # real-row count, not M_pad
    var = jnp.maximum(ss_tot / M - mean * mean, 0.0)   # biased variance (train BN)
    inv = lax.rsqrt(var + EPS)
    scale = (gamma_pad * inv).reshape(1, C_pad)
    shift = (beta_pad - mean * gamma_pad * inv).reshape(1, C_pad)

    # ---- pass 2: scale/shift + ReLU (+ residual add), lane-dense stores -----
    out_bytes = jnp.dtype(out_dtype).itemsize
    has_skip = skip is not None
    tm2 = _m2_tile(M_pad, tm, C_pad, has_skip, out_bytes)
    n_m2 = M_pad // tm2

    args = [conv_out, scale, shift]
    in_specs = [
        pl.BlockSpec((tm2, C_pad), lambda i: (i, 0)),
        pl.BlockSpec((1, C_pad), lambda i: (0, 0)),
        pl.BlockSpec((1, C_pad), lambda i: (0, 0)),
    ]
    if not has_skip:
        kernel = _bn_relu_kernel
        skip_bytes = 0
    else:
        assert skip.shape == (M_pad, C_pad), (skip.shape, (M_pad, C_pad))
        kernel = _bn_relu_add_kernel
        args.append(skip)
        in_specs.append(pl.BlockSpec((tm2, C_pad), lambda i: (i, 0)))
        skip_bytes = M_pad * C_pad * 4

    return pl.pallas_call(
        kernel,
        grid=(n_m2,),
        in_specs=in_specs,
        out_specs=pl.BlockSpec((tm2, C_pad), lambda i: (i, 0)),
        out_shape=jax.ShapeDtypeStruct((M_pad, C_pad), out_dtype),
        compiler_params=_mosaic_params(("parallel",),
                                       _pass2_footprint(tm2, C_pad, has_skip,
                                                        out_bytes)),
        cost_estimate=pl.CostEstimate(
            flops=3 * M_pad * C_pad,
            transcendentals=0,
            bytes_accessed=(M_pad * C_pad * 2 + skip_bytes
                            + M_pad * C_pad * out_bytes)),
    )(*args)


# ----------------------------------- glue ------------------------------------

def im2col(x_nhwc, ksize, stride, padding):
    """Extract conv patches -> [N*Hout*Wout, ksize*ksize*C] (bf16 passthrough).

    1x1 convs are a pure reshape (no duplication).  The 3x3 path still
    materializes a ksize^2-duplicated bf16 copy in HBM (see TODO at the top)."""
    N, H, W, C = x_nhwc.shape
    Hout = (H + 2 * padding - ksize) // stride + 1
    Wout = (W + 2 * padding - ksize) // stride + 1
    if ksize == 1 and padding == 0:
        xs = x_nhwc if stride == 1 else x_nhwc[:, ::stride, ::stride, :]
        return xs.reshape(N * Hout * Wout, C), Hout, Wout
    xp = jnp.pad(x_nhwc, ((0, 0), (padding, padding), (padding, padding), (0, 0)))
    cols = []
    for kh in range(ksize):
        for kw in range(ksize):
            cols.append(xp[:, kh:kh + stride * Hout:stride,
                           kw:kw + stride * Wout:stride, :])
    patches = jnp.concatenate(cols, axis=-1)
    return patches.reshape(N * Hout * Wout, ksize * ksize * C), Hout, Wout


def init_params(key, in_channel, out_channel):
    mid = out_channel // 4
    defs = {
        'skip': (out_channel, in_channel, 3),  # Conv2d(in, out, 3, stride, pad=1)
        'c1':   (mid, in_channel, 1),          # Conv2d(in, mid, 1)
        'c2':   (mid, mid, 3),                 # Conv2d(mid, mid, 3, stride, pad=1)
        'c3':   (out_channel, mid, 1),         # Conv2d(mid, out, 1)
    }
    params = {}
    for name, (co, ci, k) in defs.items():
        key, k1, k2, k3, k4 = jax.random.split(key, 5)
        params[name] = dict(
            w=0.2 * jax.random.normal(k1, (co, ci, k, k), jnp.float32),  # OIHW
            # Conv bias is kept for interface parity with nn.Conv2d but is a
            # mathematical no-op under training-mode BatchNorm (batch mean
            # subtracts it), so both implementations below omit it.
            b=0.1 * jax.random.normal(k2, (co,), jnp.float32),
            gamma=1.0 + 0.1 * jax.random.normal(k3, (co,), jnp.float32),
            beta=0.1 * jax.random.normal(k4, (co,), jnp.float32),
        )
    return params


def prepare_params(params):
    """One-time parameter preprocessing (hoisted out of the forward path):
    OIHW weights -> (kh*kw*Cin, Cout) im2col-matmul layout, zero-padded to the
    exact (K_pad, C_pad) the kernels use, cast to bf16; gamma/beta padded f32."""
    prep = {}
    for name, p in params.items():
        co, ci, k, _ = p['w'].shape
        K = k * k * ci
        C_pad = _round_up(co, _LANE)
        K_pad, _, _ = _k_geom(K, C_pad)
        # OIHW -> (kh, kw, Cin, Cout) -> [K, Cout], matching im2col patch order.
        w_mat = p['w'].transpose(2, 3, 1, 0).reshape(K, co)
        w_mat = jnp.pad(w_mat, ((0, K_pad - K), (0, C_pad - co)))
        prep[name] = dict(
            w_mat=w_mat.astype(jnp.bfloat16),
            gamma=jnp.pad(p['gamma'], (0, C_pad - co)).astype(jnp.float32),
            beta=jnp.pad(p['beta'], (0, C_pad - co)).astype(jnp.float32),
        )
    return prep


@partial(jax.jit, static_argnames=("out_channel", "downsample"))
def resnet_bottleneck_forward(x_nchw, prep, *, out_channel, downsample):
    stride = 2 if downsample else 1
    mid = out_channel // 4
    x = jnp.transpose(x_nchw, (0, 2, 3, 1)).astype(jnp.bfloat16)  # NCHW -> NHWC
    N = x.shape[0]

    def conv(name, inp_nhwc, ksize, s, pad, skip=None, out_dtype=jnp.float32):
        p = prep[name]
        patches, Hout, Wout = im2col(inp_nhwc, ksize, s, pad)
        out_pad = fused_conv_bn_relu(patches, p['w_mat'], p['gamma'], p['beta'],
                                     skip=skip, out_dtype=out_dtype)
        return out_pad, patches.shape[0], Hout, Wout

    # skip_conn: Conv3x3(stride) + BN + ReLU  (kept f32 & lane-padded for the add)
    skip_pad, _, _, _ = conv('skip', x, 3, stride, 1, out_dtype=jnp.float32)
    # 1x1 -> 3x3(stride) -> 1x1, each Conv+BN+ReLU.  Intermediate activations
    # are emitted directly in bf16 (they feed the next bf16 matmul anyway);
    # the residual is added after the last ReLU (matches the PyTorch module:
    # relu inside third_conv / skip_conn, then x + skip, no extra relu).
    y1_pad, M1, H1, W1 = conv('c1', x, 1, 1, 0, out_dtype=jnp.bfloat16)
    y1 = y1_pad[:M1, :mid].reshape(N, H1, W1, mid)
    y2_pad, M2, H2, W2 = conv('c2', y1, 3, stride, 1, out_dtype=jnp.bfloat16)
    y2 = y2_pad[:M2, :mid].reshape(N, H2, W2, mid)
    y3_pad, M3, H3, W3 = conv('c3', y2, 1, 1, 0, skip=skip_pad,
                              out_dtype=jnp.float32)
    out = y3_pad[:M3, :out_channel].reshape(N, H3, W3, out_channel)
    return jnp.transpose(out, (0, 3, 1, 2)).astype(jnp.float32)   # NHWC -> NCHW


# -------------------------- pure-JAX reference check -------------------------

def reference_forward(x_nchw, params, downsample):
    """Independent XLA reference following the same mixed-precision policy as
    the Pallas path: bf16 MXU conv inputs with f32 accumulation, BatchNorm
    statistics from the f32 conv output, conv activations stored in bf16
    before the BN apply, bf16 activations between intermediate layers.
    The conv bias is omitted on both paths: training-mode BN subtracts the
    batch mean, which cancels a per-channel bias exactly."""
    stride = 2 if downsample else 1
    x = jnp.transpose(x_nchw, (0, 2, 3, 1)).astype(jnp.bfloat16)

    def conv_bn_relu(inp_bf16, p, s, pad, out_bf16):
        w = jnp.transpose(p['w'], (2, 3, 1, 0)).astype(jnp.bfloat16)  # OIHW->HWIO
        y32 = lax.conv_general_dilated(inp_bf16, w, (s, s),
                                       [(pad, pad), (pad, pad)],
                                       dimension_numbers=('NHWC', 'HWIO', 'NHWC'),
                                       preferred_element_type=jnp.float32)
        mean = jnp.mean(y32, axis=(0, 1, 2))
        var = jnp.mean((y32 - mean) ** 2, axis=(0, 1, 2))
        scale = p['gamma'] * lax.rsqrt(var + EPS)
        shift = p['beta'] - mean * scale
        yq = y32.astype(jnp.bfloat16).astype(jnp.float32)
        y = jnp.maximum(yq * scale + shift, 0.0)
        return y.astype(jnp.bfloat16) if out_bf16 else y

    skip = conv_bn_relu(x, params['skip'], stride, 1, out_bf16=False)
    y = conv_bn_relu(x, params['c1'], 1, 0, out_bf16=True)
    y = conv_bn_relu(y, params['c2'], stride, 1, out_bf16=True)
    y = conv_bn_relu(y, params['c3'], 1, 0, out_bf16=False)
    return jnp.transpose(y + skip, (0, 3, 1, 2))


if __name__ == "__main__":
    key = jax.random.PRNGKey(0)
    kx, kp = jax.random.split(key)

    in_channel, out_channel, downsample = 4, 16, True
    x = jax.random.normal(kx, (2, in_channel, 16, 16), jnp.float32)
    params = init_params(kp, in_channel, out_channel)
    prep = prepare_params(params)   # one-time weight/affine preprocessing

    out = resnet_bottleneck_forward(x, prep, out_channel=out_channel,
                                    downsample=downsample)
    out = jax.block_until_ready(out)
    assert out.shape == (2, out_channel, 8, 8), out.shape

    ref = reference_forward(x, params, downsample)
    # Both paths share the same mixed-precision policy (bf16 MXU inputs, f32
    # accumulation and statistics, bf16 storage of conv outputs and of the
    # intermediate activations), so the remaining difference is summation
    # order inside the two conv implementations plus the occasional 1-ulp
    # bf16 rounding flip it can cause, slightly amplified by the BatchNorm
    # normalisation across four layers.  Typical max |diff| is ~1e-3.
    max_err = float(jnp.max(jnp.abs(out - ref)))
    assert max_err < 5e-2, max_err

    print("KERNEL_OK")
</pallas_src>

<mosaic_0001>
module attributes {stable_mosaic.version = 11 : i64} {
  func.func @_conv_stats_kernel(%arg0: i32, %arg1: i32, %arg2: memref<512x16xbf16, #tpu.memory_space<vmem>>, %arg3: memref<16x128xbf16, #tpu.memory_space<vmem>>, %arg4: memref<512x128xbf16, #tpu.memory_space<vmem>>, %arg5: memref<1x8x128xf32, #tpu.memory_space<vmem>>, %arg6: memref<512x128xf32, #tpu.memory_space<vmem>>) attributes {dimension_semantics = [#tpu.dimension_semantics<parallel>, #tpu.dimension_semantics<arbitrary>], iteration_bounds = array<i64: 1, 1>, scalar_prefetch = 0 : i64, scratch_operands = 1 : i64, tpu.core_type = #tpu.core_type<tc>, window_params = [{transform_indices = @transform_0, window_bounds = array<i64: 512, 16>}, {transform_indices = @transform_1, window_bounds = array<i64: 16, 128>}, {transform_indices = @transform_2, window_bounds = array<i64: 512, 128>}, {transform_indices = @transform_3, window_bounds = array<i64: 1, 8, 128>}]} {
    %c0_i32 = arith.constant 0 : i32
    %0 = arith.cmpi eq, %arg1, %c0_i32 : i32
    %1 = arith.extui %0 : i1 to i32
    %c0_i32_0 = arith.constant 0 : i32
    %2 = arith.cmpi ne, %1, %c0_i32_0 : i32
    scf.if %2 {
      %cst_10 = arith.constant 0.000000e+00 : f32
      %12 = vector.broadcast %cst_10 : f32 to vector<512x128xf32>
      %c0_11 = arith.constant 0 : index
      %c0_12 = arith.constant 0 : index
      %13 = vector.load %arg6[%c0_11, %c0_12] : memref<512x128xf32, #tpu.memory_space<vmem>>, vector<512x128xf32>
      tpu.vector_store %arg6[%c0_11, %c0_12], %12 {strides = array<i32>} : memref<512x128xf32, #tpu.memory_space<vmem>>, vector<512x128xf32>,
    } else {
    }
    %c0 = arith.constant 0 : index
    %c0_1 = arith.constant 0 : index
    %3 = vector.load %arg6[%c0, %c0_1] : memref<512x128xf32, #tpu.memory_space<vmem>>, vector<512x128xf32>
    %c0_2 = arith.constant 0 : index
    %c0_3 = arith.constant 0 : index
    %4 = vector.load %arg2[%c0_2, %c0_3] : memref<512x16xbf16, #tpu.memory_space<vmem>>, vector<512x16xbf16>
    %c0_4 = arith.constant 0 : index
    %c0_5 = arith.constant 0 : index
    %5 = vector.load %arg3[%c0_4, %c0_5] : memref<16x128xbf16, #tpu.memory_space<vmem>>, vector<16x128xbf16>
    %cst = arith.constant dense<0.000000e+00> : vector<512x128xf32>
    %6 = tpu.matmul %4, %5, %cst {dimension_numbers = #tpu.dot_dimension_numbers<[1], [0], [0], [1], [0, 0, 1, 1], [], []>} : vector<512x16xbf16>, vector<16x128xbf16>, vector<512x128xf32> -> vector<512x128xf32>
    %7 = arith.addf %3, %6 : vector<512x128xf32>
    %c0_6 = arith.constant 0 : index
    %c0_7 = arith.constant 0 : index
    %8 = vector.load %arg6[%c0_6, %c0_7] : memref<512x128xf32, #tpu.memory_space<vmem>>, vector<512x128xf32>
    tpu.vector_store %arg6[%c0_6, %c0_7], %7 {strides = array<i32>} : memref<512x128xf32, #tpu.memory_space<vmem>>, vector<512x128xf32>,
    %c0_i32_8 = arith.constant 0 : i32
    %9 = arith.cmpi eq, %arg1, %c0_i32_8 : i32
    %10 = arith.extui %9 : i1 to i32
    %c0_i32_9 = arith.constant 0 : i32
    %11 = arith.cmpi ne, %10, %c0_i32_9 : i32
    scf.if %11 {
      %c0_10 = arith.constant 0 : index
      %c0_11 = arith.constant 0 : index
      %12 = vector.load %arg6[%c0_10, %c0_11] : memref<512x128xf32, #tpu.memory_space<vmem>>, vector<512x128xf32>
      %13 = arith.truncf %12 : vector<512x128xf32> to vector<512x128xbf16>
      %c0_12 = arith.constant 0 : index
      %c0_13 = arith.constant 0 : index
      %14 = vector.load %arg4[%c0_12, %c0_13] : memref<512x128xbf16, #tpu.memory_space<vmem>>, vector<512x128xbf16>
      tpu.vector_store %arg4[%c0_12, %c0_13], %13 {strides = array<i32>} : memref<512x128xbf16, #tpu.memory_space<vmem>>, vector<512x128xbf16>,
      %cst_14 = arith.constant dense<0.000000e+00> : vector<128xf32>
      %15 = vector.multi_reduction <add>, %12, %cst_14 [0] : vector<512x128xf32> to vector<128xf32>
      %16 = vector.shape_cast %15 : vector<128xf32> to vector<1x128xf32>
      %17 = arith.mulf %12, %12 : vector<512x128xf32>
      %cst_15 = arith.constant dense<0.000000e+00> : vector<128xf32>
      %18 = vector.multi_reduction <add>, %17, %cst_15 [0] : vector<512x128xf32> to vector<128xf32>
      %19 = vector.shape_cast %18 : vector<128xf32> to vector<1x128xf32>
      %20 = tpu.iota {dimensions = array<i32: 0>} : vector<8x128xi32>
      %c0_i32_16 = arith.constant 0 : i32
      %21 = vector.broadcast %c0_i32_16 : i32 to vector<8x128xi32>
      %22 = arith.cmpi eq, %20, %21 : vector<8x128xi32>
      %cst_17 = arith.constant 0.000000e+00 : f32
      %23 = vector.shape_cast %16 : vector<1x128xf32> to vector<1x128xf32>
      %24 = vector.broadcast %23 : vector<1x128xf32> to vector<8x128xf32>
      %25 = vector.broadcast %cst_17 : f32 to vector<8x128xf32>
      %26 = arith.select %22, %24, %25 : vector<8x128xi1>, vector<8x128xf32>
      %c1_i32 = arith.constant 1 : i32
      %27 = vector.broadcast %c1_i32 : i32 to vector<8x128xi32>
      %28 = arith.cmpi eq, %20, %27 : vector<8x128xi32>
      %cst_18 = arith.constant 0.000000e+00 : f32
      %29 = vector.shape_cast %19 : vector<1x128xf32> to vector<1x128xf32>
      %30 = vector.broadcast %29 : vector<1x128xf32> to vector<8x128xf32>
      %31 = vector.broadcast %cst_18 : f32 to vector<8x128xf32>
      %32 = arith.select %28, %30, %31 : vector<8x128xi1>, vector<8x128xf32>
      %33 = arith.addf %26, %32 : vector<8x128xf32>
      %c0_19 = arith.constant 0 : index
      %c0_20 = arith.constant 0 : index
      %c0_21 = arith.constant 0 : index
      %34 = vector.load %arg5[%c0_19, %c0_20, %c0_21] : memref<1x8x128xf32, #tpu.memory_space<vmem>>, vector<1x8x128xf32>
      %35 = vector.shape_cast %34 : vector<1x8x128xf32> to vector<8x128xf32>
      %36 = vector.shape_cast %33 : vector<8x128xf32> to vector<1x8x128xf32>
      tpu.vector_store %arg5[%c0_19, %c0_20, %c0_21], %36 {strides = array<i32>} : memref<1x8x128xf32, #tpu.memory_space<vmem>>, vector<1x8x128xf32>,
    } else {
    }
    return
  }
  func.func @transform_0(%arg0: i32, %arg1: i32) -> (i32, i32) {
    %c0_i32 = arith.constant 0 : i32
    return %arg0, %arg1 : i32, i32
  }
  func.func @transform_1(%arg0: i32, %arg1: i32) -> (i32, i32) {
    %c0_i32 = arith.constant 0 : i32
    %c0_i32_0 = arith.constant 0 : i32
    return %arg1, %c0_i32 : i32, i32
  }
  func.func @transform_2(%arg0: i32, %arg1: i32) -> (i32, i32) {
    %c0_i32 = arith.constant 0 : i32
    %c0_i32_0 = arith.constant 0 : i32
    return %arg0, %c0_i32 : i32, i32
  }
  func.func @transform_3(%arg0: i32, %arg1: i32) -> (i32, i32, i32) {
    %c0_i32 = arith.constant 0 : i32
    %c0_i32_0 = arith.constant 0 : i32
    %c0_i32_1 = arith.constant 0 : i32
    return %arg0, %c0_i32, %c0_i32_0 : i32, i32, i32
  }
}

module attributes {stable_mosaic.version = 11 : i64} {
  func.func @_bn_relu_kernel(%arg0: i32, %arg1: memref<512x128xbf16, #tpu.memory_space<vmem>>, %arg2: memref<1x128xf32, #tpu.memory_space<vmem>>, %arg3: memref<1x128xf32, #tpu.memory_space<vmem>>, %arg4: memref<512x128xbf16, #tpu.memory_space<vmem>>) attributes {dimension_semantics = [#tpu.dimension_semantics<parallel>], iteration_bounds = array<i64: 1>, scalar_prefetch = 0 : i64, scratch_operands = 0 : i64, tpu.core_type = #tpu.core_type<tc>, window_params = [{transform_indices = @transform_0, window_bounds = array<i64: 512, 128>}, {pipeline_mode = #tpu.pipeline_mode<synchronous>, transform_indices = @transform_1, window_bounds = array<i64: 1, 128>}, {pipeline_mode = #tpu.pipeline_mode<synchronous>, transform_indices = @transform_2, window_bounds = array<i64: 1, 128>}, {transform_indices = @transform_3, window_bounds = array<i64: 512, 128>}]} {
    %c0 = arith.constant 0 : index
    %c0_0 = arith.constant 0 : index
    %0 = vector.load %arg1[%c0, %c0_0] : memref<512x128xbf16, #tpu.memory_space<vmem>>, vector<512x128xbf16>
    %1 = arith.extf %0 : vector<512x128xbf16> to vector<512x128xf32>
    %c0_1 = arith.constant 0 : index
    %c0_2 = arith.constant 0 : index
    %2 = vector.load %arg2[%c0_1, %c0_2] : memref<1x128xf32, #tpu.memory_space<vmem>>, vector<1x128xf32>
    %3 = vector.broadcast %2 : vector<1x128xf32> to vector<512x128xf32>
    %4 = arith.mulf %1, %3 : vector<512x128xf32>
    %c0_3 = arith.constant 0 : index
    %c0_4 = arith.constant 0 : index
    %5 = vector.load %arg3[%c0_3, %c0_4] : memref<1x128xf32, #tpu.memory_space<vmem>>, vector<1x128xf32>
    %6 = vector.broadcast %5 : vector<1x128xf32> to vector<512x128xf32>
    %7 = arith.addf %4, %6 : vector<512x128xf32>
    %cst = arith.constant 0.000000e+00 : f32
    %8 = vector.broadcast %cst : f32 to vector<512x128xf32>
    %9 = arith.maximumf %7, %8 : vector<512x128xf32>
    %10 = arith.truncf %9 : vector<512x128xf32> to vector<512x128xbf16>
    %c0_5 = arith.constant 0 : index
    %c0_6 = arith.constant 0 : index
    %11 = vector.load %arg4[%c0_5, %c0_6] : memref<512x128xbf16, #tpu.memory_space<vmem>>, vector<512x128xbf16>
    tpu.vector_store %arg4[%c0_5, %c0_6], %10 {strides = array<i32>} : memref<512x128xbf16, #tpu.memory_space<vmem>>, vector<512x128xbf16>,
    return
  }
  func.func @transform_0(%arg0: i32) -> (i32, i32) {
    %c0_i32 = arith.constant 0 : i32
    %c0_i32_0 = arith.constant 0 : i32
    return %arg0, %c0_i32 : i32, i32
  }
  func.func @transform_1(%arg0: i32) -> (i32, i32) {
    %c0_i32 = arith.constant 0 : i32
    %c0_i32_0 = arith.constant 0 : i32
    %c0_i32_1 = arith.constant 0 : i32
    return %c0_i32, %c0_i32_0 : i32, i32
  }
  func.func @transform_2(%arg0: i32) -> (i32, i32) {
    %c0_i32 = arith.constant 0 : i32
    %c0_i32_0 = arith.constant 0 : i32
    %c0_i32_1 = arith.constant 0 : i32
    return %c0_i32, %c0_i32_0 : i32, i32
  }
  func.func @transform_3(%arg0: i32) -> (i32, i32) {
    %c0_i32 = arith.constant 0 : i32
    %c0_i32_0 = arith.constant 0 : i32
    return %arg0, %c0_i32 : i32, i32
  }
}

module attributes {stable_mosaic.version = 11 : i64} {
  func.func @_conv_stats_kernel(%arg0: i32, %arg1: i32, %arg2: memref<128x48xbf16, #tpu.memory_space<vmem>>, %arg3: memref<48x128xbf16, #tpu.memory_space<vmem>>, %arg4: memref<128x128xbf16, #tpu.memory_space<vmem>>, %arg5: memref<1x8x128xf32, #tpu.memory_space<vmem>>, %arg6: memref<128x128xf32, #tpu.memory_space<vmem>>) attributes {dimension_semantics = [#tpu.dimension_semantics<parallel>, #tpu.dimension_semantics<arbitrary>], iteration_bounds = array<i64: 1, 1>, scalar_prefetch = 0 : i64, scratch_operands = 1 : i64, tpu.core_type = #tpu.core_type<tc>, window_params = [{transform_indices = @transform_0, window_bounds = array<i64: 128, 48>}, {transform_indices = @transform_1, window_bounds = array<i64: 48, 128>}, {transform_indices = @transform_2, window_bounds = array<i64: 128, 128>}, {transform_indices = @transform_3, window_bounds = array<i64: 1, 8, 128>}]} {
    %c0_i32 = arith.constant 0 : i32
    %0 = arith.cmpi eq, %arg1, %c0_i32 : i32
    %1 = arith.extui %0 : i1 to i32
    %c0_i32_0 = arith.constant 0 : i32
    %2 = arith.cmpi ne, %1, %c0_i32_0 : i32
    scf.if %2 {
      %cst_10 = arith.constant 0.000000e+00 : f32
      %12 = vector.broadcast %cst_10 : f32 to vector<128x128xf32>
      %c0_11 = arith.constant 0 : index
      %c0_12 = arith.constant 0 : index
      %13 = vector.load %arg6[%c0_11, %c0_12] : memref<128x128xf32, #tpu.memory_space<vmem>>, vector<128x128xf32>
      tpu.vector_store %arg6[%c0_11, %c0_12], %12 {strides = array<i32>} : memref<128x128xf32, #tpu.memory_space<vmem>>, vector<128x128xf32>,
    } else {
    }
    %c0 = arith.constant 0 : index
    %c0_1 = arith.constant 0 : index
    %3 = vector.load %arg6[%c0, %c0_1] : memref<128x128xf32, #tpu.memory_space<vmem>>, vector<128x128xf32>
    %c0_2 = arith.constant 0 : index
    %c0_3 = arith.constant 0 : index
    %4 = vector.load %arg2[%c0_2, %c0_3] : memref<128x48xbf16, #tpu.memory_space<vmem>>, vector<128x48xbf16>
    %c0_4 = arith.constant 0 : index
    %c0_5 = arith.constant 0 : index
    %5 = vector.load %arg3[%c0_4, %c0_5] : memref<48x128xbf16, #tpu.memory_space<vmem>>, vector<48x128xbf16>
    %cst = arith.constant dense<0.000000e+00> : vector<128x128xf32>
    %6 = tpu.matmul %4, %5, %cst {dimension_numbers = #tpu.dot_dimension_numbers<[1], [0], [0], [1], [0, 0, 1, 1], [], []>} : vector<128x48xbf16>, vector<48x128xbf16>, vector<128x128xf32> -> vector<128x128xf32>
    %7 = arith.addf %3, %6 : vector<128x128xf32>
    %c0_6 = arith.constant 0 : index
    %c0_7 = arith.constant 0 : index
    %8 = vector.load %arg6[%c0_6, %c0_7] : memref<128x128xf32, #tpu.memory_space<vmem>>, vector<128x128xf32>
    tpu.vector_store %arg6[%c0_6, %c0_7], %7 {strides = array<i32>} : memref<128x128xf32, #tpu.memory_space<vmem>>, vector<128x128xf32>,
    %c0_i32_8 = arith.constant 0 : i32
    %9 = arith.cmpi eq, %arg1, %c0_i32_8 : i32
    %10 = arith.extui %9 : i1 to i32
    %c0_i32_9 = arith.constant 0 : i32
    %11 = arith.cmpi ne, %10, %c0_i32_9 : i32
    scf.if %11 {
      %c0_10 = arith.constant 0 : index
      %c0_11 = arith.constant 0 : index
      %12 = vector.load %arg6[%c0_10, %c0_11] : memref<128x128xf32, #tpu.memory_space<vmem>>, vector<128x128xf32>
      %13 = arith.truncf %12 : vector<128x128xf32> to vector<128x128xbf16>
      %c0_12 = arith.constant 0 : index
      %c0_13 = arith.constant 0 : index
      %14 = vector.load %arg4[%c0_12, %c0_13] : memref<128x128xbf16, #tpu.memory_space<vmem>>, vector<128x128xbf16>
      tpu.vector_store %arg4[%c0_12, %c0_13], %13 {strides = array<i32>} : memref<128x128xbf16, #tpu.memory_space<vmem>>, vector<128x128xbf16>,
      %cst_14 = arith.constant dense<0.000000e+00> : vector<128xf32>
      %15 = vector.multi_reduction <add>, %12, %cst_14 [0] : vector<128x128xf32> to vector<128xf32>
      %16 = vector.shape_cast %15 : vector<128xf32> to vector<1x128xf32>
      %17 = arith.mulf %12, %12 : vector<128x128xf32>
      %cst_15 = arith.constant dense<0.000000e+00> : vector<128xf32>
      %18 = vector.multi_reduction <add>, %17, %cst_15 [0] : vector<128x128xf32> to vector<128xf32>
      %19 = vector.shape_cast %18 : vector<128xf32> to vector<1x128xf32>
      %20 = tpu.iota {dimensions = array<i32: 0>} : vector<8x128xi32>
      %c0_i32_16 = arith.constant 0 : i32
      %21 = vector.broadcast %c0_i32_16 : i32 to vector<8x128xi32>
      %22 = arith.cmpi eq, %20, %21 : vector<8x128xi32>
      %cst_17 = arith.constant 0.000000e+00 : f32
      %23 = vector.shape_cast %16 : vector<1x128xf32> to vector<1x128xf32>
      %24 = vector.broadcast %23 : vector<1x128xf32> to vector<8x128xf32>
      %25 = vector.broadcast %cst_17 : f32 to vector<8x128xf32>
      %26 = arith.select %22, %24, %25 : vector<8x128xi1>, vector<8x128xf32>
      %c1_i32 = arith.constant 1 : i32
      %27 = vector.broadcast %c1_i32 : i32 to vector<8x128xi32>
      %28 = arith.cmpi eq, %20, %27 : vector<8x128xi32>
      %cst_18 = arith.constant 0.000000e+00 : f32
      %29 = vector.shape_cast %19 : vector<1x128xf32> to vector<1x128xf32>
      %30 = vector.broadcast %29 : vector<1x128xf32> to vector<8x128xf32>
      %31 = vector.broadcast %cst_18 : f32 to vector<8x128xf32>
      %32 = arith.select %28, %30, %31 : vector<8x128xi1>, vector<8x128xf32>
      %33 = arith.addf %26, %32 : vector<8x128xf32>
      %c0_19 = arith.constant 0 : index
      %c0_20 = arith.constant 0 : index
      %c0_21 = arith.constant 0 : index
      %34 = vector.load %arg5[%c0_19, %c0_20, %c0_21] : memref<1x8x128xf32, #tpu.memory_space<vmem>>, vector<1x8x128xf32>
      %35 = vector.shape_cast %34 : vector<1x8x128xf32> to vector<8x128xf32>
      %36 = vector.shape_cast %33 : vector<8x128xf32> to vector<1x8x128xf32>
      tpu.vector_store %arg5[%c0_19, %c0_20, %c0_21], %36 {strides = array<i32>} : memref<1x8x128xf32, #tpu.memory_space<vmem>>, vector<1x8x128xf32>,
    } else {
    }
    return
  }
  func.func @transform_0(%arg0: i32, %arg1: i32) -> (i32, i32) {
    %c0_i32 = arith.constant 0 : i32
    return %arg0, %arg1 : i32, i32
  }
  func.func @transform_1(%arg0: i32, %arg1: i32) -> (i32, i32) {
    %c0_i32 = arith.constant 0 : i32
    %c0_i32_0 = arith.constant 0 : i32
    return %arg1, %c0_i32 : i32, i32
  }
  func.func @transform_2(%arg0: i32, %arg1: i32) -> (i32, i32) {
    %c0_i32 = arith.constant 0 : i32
    %c0_i32_0 = arith.constant 0 : i32
    return %arg0, %c0_i32 : i32, i32
  }
  func.func @transform_3(%arg0: i32, %arg1: i32) -> (i32, i32, i32) {
    %c0_i32 = arith.constant 0 : i32
    %c0_i32_0 = arith.constant 0 : i32
    %c0_i32_1 = arith.constant 0 : i32
    return %arg0, %c0_i32, %c0_i32_0 : i32, i32, i32
  }
}

module attributes {stable_mosaic.version = 11 : i64} {
  func.func @_bn_relu_kernel(%arg0: i32, %arg1: memref<128x128xbf16, #tpu.memory_space<vmem>>, %arg2: memref<1x128xf32, #tpu.memory_space<vmem>>, %arg3: memref<1x128xf32, #tpu.memory_space<vmem>>, %arg4: memref<128x128xbf16, #tpu.memory_space<vmem>>) attributes {dimension_semantics = [#tpu.dimension_semantics<parallel>], iteration_bounds = array<i64: 1>, scalar_prefetch = 0 : i64, scratch_operands = 0 : i64, tpu.core_type = #tpu.core_type<tc>, window_params = [{transform_indices = @transform_0, window_bounds = array<i64: 128, 128>}, {pipeline_mode = #tpu.pipeline_mode<synchronous>, transform_indices = @transform_1, window_bounds = array<i64: 1, 128>}, {pipeline_mode = #tpu.pipeline_mode<synchronous>, transform_indices = @transform_2, window_bounds = array<i64: 1, 128>}, {transform_indices = @transform_3, window_bounds = array<i64: 128, 128>}]} {
    %c0 = arith.constant 0 : index
    %c0_0 = arith.constant 0 : index
    %0 = vector.load %arg1[%c0, %c0_0] : memref<128x128xbf16, #tpu.memory_space<vmem>>, vector<128x128xbf16>
    %1 = arith.extf %0 : vector<128x128xbf16> to vector<128x128xf32>
    %c0_1 = arith.constant 0 : index
    %c0_2 = arith.constant 0 : index
    %2 = vector.load %arg2[%c0_1, %c0_2] : memref<1x128xf32, #tpu.memory_space<vmem>>, vector<1x128xf32>
    %3 = vector.broadcast %2 : vector<1x128xf32> to vector<128x128xf32>
    %4 = arith.mulf %1, %3 : vector<128x128xf32>
    %c0_3 = arith.constant 0 : index
    %c0_4 = arith.constant 0 : index
    %5 = vector.load %arg3[%c0_3, %c0_4] : memref<1x128xf32, #tpu.memory_space<vmem>>, vector<1x128xf32>
    %6 = vector.broadcast %5 : vector<1x128xf32> to vector<128x128xf32>
    %7 = arith.addf %4, %6 : vector<128x128xf32>
    %cst = arith.constant 0.000000e+00 : f32
    %8 = vector.broadcast %cst : f32 to vector<128x128xf32>
    %9 = arith.maximumf %7, %8 : vector<128x128xf32>
    %10 = arith.truncf %9 : vector<128x128xf32> to vector<128x128xbf16>
    %c0_5 = arith.constant 0 : index
    %c0_6 = arith.constant 0 : index
    %11 = vector.load %arg4[%c0_5, %c0_6] : memref<128x128xbf16, #tpu.memory_space<vmem>>, vector<128x128xbf16>
    tpu.vector_store %arg4[%c0_5, %c0_6], %10 {strides = array<i32>} : memref<128x128xbf16, #tpu.memory_space<vmem>>, vector<128x128xbf16>,
    return
  }
  func.func @transform_0(%arg0: i32) -> (i32, i32) {
    %c0_i32 = arith.constant 0 : i32
    %c0_i32_0 = arith.constant 0 : i32
    return %arg0, %c0_i32 : i32, i32
  }
  func.func @transform_1(%arg0: i32) -> (i32, i32) {
    %c0_i32 = arith.constant 0 : i32
    %c0_i32_0 = arith.constant 0 : i32
    %c0_i32_1 = arith.constant 0 : i32
    return %c0_i32, %c0_i32_0 : i32, i32
  }
  func.func @transform_2(%arg0: i32) -> (i32, i32) {
    %c0_i32 = arith.constant 0 : i32
    %c0_i32_0 = arith.constant 0 : i32
    %c0_i32_1 = arith.constant 0 : i32
    return %c0_i32, %c0_i32_0 : i32, i32
  }
  func.func @transform_3(%arg0: i32) -> (i32, i32) {
    %c0_i32 = arith.constant 0 : i32
    %c0_i32_0 = arith.constant 0 : i32
    return %arg0, %c0_i32 : i32, i32
  }
}

module attributes {stable_mosaic.version = 11 : i64} {
  func.func @_conv_stats_kernel(%arg0: i32, %arg1: i32, %arg2: memref<128x16xbf16, #tpu.memory_space<vmem>>, %arg3: memref<16x128xbf16, #tpu.memory_space<vmem>>, %arg4: memref<128x128xbf16, #tpu.memory_space<vmem>>, %arg5: memref<1x8x128xf32, #tpu.memory_space<vmem>>, %arg6: memref<128x128xf32, #tpu.memory_space<vmem>>) attributes {dimension_semantics = [#tpu.dimension_semantics<parallel>, #tpu.dimension_semantics<arbitrary>], iteration_bounds = array<i64: 1, 1>, scalar_prefetch = 0 : i64, scratch_operands = 1 : i64, tpu.core_type = #tpu.core_type<tc>, window_params = [{transform_indices = @transform_0, window_bounds = array<i64: 128, 16>}, {transform_indices = @transform_1, window_bounds = array<i64: 16, 128>}, {transform_indices = @transform_2, window_bounds = array<i64: 128, 128>}, {transform_indices = @transform_3, window_bounds = array<i64: 1, 8, 128>}]} {
    %c0_i32 = arith.constant 0 : i32
    %0 = arith.cmpi eq, %arg1, %c0_i32 : i32
    %1 = arith.extui %0 : i1 to i32
    %c0_i32_0 = arith.constant 0 : i32
    %2 = arith.cmpi ne, %1, %c0_i32_0 : i32
    scf.if %2 {
      %cst_10 = arith.constant 0.000000e+00 : f32
      %12 = vector.broadcast %cst_10 : f32 to vector<128x128xf32>
      %c0_11 = arith.constant 0 : index
      %c0_12 = arith.constant 0 : index
      %13 = vector.load %arg6[%c0_11, %c0_12] : memref<128x128xf32, #tpu.memory_space<vmem>>, vector<128x128xf32>
      tpu.vector_store %arg6[%c0_11, %c0_12], %12 {strides = array<i32>} : memref<128x128xf32, #tpu.memory_space<vmem>>, vector<128x128xf32>,
    } else {
    }
    %c0 = arith.constant 0 : index
    %c0_1 = arith.constant 0 : index
    %3 = vector.load %arg6[%c0, %c0_1] : memref<128x128xf32, #tpu.memory_space<vmem>>, vector<128x128xf32>
    %c0_2 = arith.constant 0 : index
    %c0_3 = arith.constant 0 : index
    %4 = vector.load %arg2[%c0_2, %c0_3] : memref<128x16xbf16, #tpu.memory_space<vmem>>, vector<128x16xbf16>
    %c0_4 = arith.constant 0 : index
    %c0_5 = arith.constant 0 : index
    %5 = vector.load %arg3[%c0_4, %c0_5] : memref<16x128xbf16, #tpu.memory_space<vmem>>, vector<16x128xbf16>
    %cst = arith.constant dense<0.000000e+00> : vector<128x128xf32>
    %6 = tpu.matmul %4, %5, %cst {dimension_numbers = #tpu.dot_dimension_numbers<[1], [0], [0], [1], [0, 0, 1, 1], [], []>} : vector<128x16xbf16>, vector<16x128xbf16>, vector<128x128xf32> -> vector<128x128xf32>
    %7 = arith.addf %3, %6 : vector<128x128xf32>
    %c0_6 = arith.constant 0 : index
    %c0_7 = arith.constant 0 : index
    %8 = vector.load %arg6[%c0_6, %c0_7] : memref<128x128xf32, #tpu.memory_space<vmem>>, vector<128x128xf32>
    tpu.vector_store %arg6[%c0_6, %c0_7], %7 {strides = array<i32>} : memref<128x128xf32, #tpu.memory_space<vmem>>, vector<128x128xf32>,
    %c0_i32_8 = arith.constant 0 : i32
    %9 = arith.cmpi eq, %arg1, %c0_i32_8 : i32
    %10 = arith.extui %9 : i1 to i32
    %c0_i32_9 = arith.constant 0 : i32
    %11 = arith.cmpi ne, %10, %c0_i32_9 : i32
    scf.if %11 {
      %c0_10 = arith.constant 0 : index
      %c0_11 = arith.constant 0 : index
      %12 = vector.load %arg6[%c0_10, %c0_11] : memref<128x128xf32, #tpu.memory_space<vmem>>, vector<128x128xf32>
      %13 = arith.truncf %12 : vector<128x128xf32> to vector<128x128xbf16>
      %c0_12 = arith.constant 0 : index
      %c0_13 = arith.constant 0 : index
      %14 = vector.load %arg4[%c0_12, %c0_13] : memref<128x128xbf16, #tpu.memory_space<vmem>>, vector<128x128xbf16>
      tpu.vector_store %arg4[%c0_12, %c0_13], %13 {strides = array<i32>} : memref<128x128xbf16, #tpu.memory_space<vmem>>, vector<128x128xbf16>,
      %cst_14 = arith.constant dense<0.000000e+00> : vector<128xf32>
      %15 = vector.multi_reduction <add>, %12, %cst_14 [0] : vector<128x128xf32> to vector<128xf32>
      %16 = vector.shape_cast %15 : vector<128xf32> to vector<1x128xf32>
      %17 = arith.mulf %12, %12 : vector<128x128xf32>
      %cst_15 = arith.constant dense<0.000000e+00> : vector<128xf32>
      %18 = vector.multi_reduction <add>, %17, %cst_15 [0] : vector<128x128xf32> to vector<128xf32>
      %19 = vector.shape_cast %18 : vector<128xf32> to vector<1x128xf32>
      %20 = tpu.iota {dimensions = array<i32: 0>} : vector<8x128xi32>
      %c0_i32_16 = arith.constant 0 : i32
      %21 = vector.broadcast %c0_i32_16 : i32 to vector<8x128xi32>
      %22 = arith.cmpi eq, %20, %21 : vector<8x128xi32>
      %cst_17 = arith.constant 0.000000e+00 : f32
      %23 = vector.shape_cast %16 : vector<1x128xf32> to vector<1x128xf32>
      %24 = vector.broadcast %23 : vector<1x128xf32> to vector<8x128xf32>
      %25 = vector.broadcast %cst_17 : f32 to vector<8x128xf32>
      %26 = arith.select %22, %24, %25 : vector<8x128xi1>, vector<8x128xf32>
      %c1_i32 = arith.constant 1 : i32
      %27 = vector.broadcast %c1_i32 : i32 to vector<8x128xi32>
      %28 = arith.cmpi eq, %20, %27 : vector<8x128xi32>
      %cst_18 = arith.constant 0.000000e+00 : f32
      %29 = vector.shape_cast %19 : vector<1x128xf32> to vector<1x128xf32>
      %30 = vector.broadcast %29 : vector<1x128xf32> to vector<8x128xf32>
      %31 = vector.broadcast %cst_18 : f32 to vector<8x128xf32>
      %32 = arith.select %28, %30, %31 : vector<8x128xi1>, vector<8x128xf32>
      %33 = arith.addf %26, %32 : vector<8x128xf32>
      %c0_19 = arith.constant 0 : index
      %c0_20 = arith.constant 0 : index
      %c0_21 = arith.constant 0 : index
      %34 = vector.load %arg5[%c0_19, %c0_20, %c0_21] : memref<1x8x128xf32, #tpu.memory_space<vmem>>, vector<1x8x128xf32>
      %35 = vector.shape_cast %34 : vector<1x8x128xf32> to vector<8x128xf32>
      %36 = vector.shape_cast %33 : vector<8x128xf32> to vector<1x8x128xf32>
      tpu.vector_store %arg5[%c0_19, %c0_20, %c0_21], %36 {strides = array<i32>} : memref<1x8x128xf32, #tpu.memory_space<vmem>>, vector<1x8x128xf32>,
    } else {
    }
    return
  }
  func.func @transform_0(%arg0: i32, %arg1: i32) -> (i32, i32) {
    %c0_i32 = arith.constant 0 : i32
    return %arg0, %arg1 : i32, i32
  }
  func.func @transform_1(%arg0: i32, %arg1: i32) -> (i32, i32) {
    %c0_i32 = arith.constant 0 : i32
    %c0_i32_0 = arith.constant 0 : i32
    return %arg1, %c0_i32 : i32, i32
  }
  func.func @transform_2(%arg0: i32, %arg1: i32) -> (i32, i32) {
    %c0_i32 = arith.constant 0 : i32
    %c0_i32_0 = arith.constant 0 : i32
    return %arg0, %c0_i32 : i32, i32
  }
  func.func @transform_3(%arg0: i32, %arg1: i32) -> (i32, i32, i32) {
    %c0_i32 = arith.constant 0 : i32
    %c0_i32_0 = arith.constant 0 : i32
    %c0_i32_1 = arith.constant 0 : i32
    return %arg0, %c0_i32, %c0_i32_0 : i32, i32, i32
  }
}

module attributes {stable_mosaic.version = 11 : i64} {
  func.func @_bn_relu_kernel(%arg0: i32, %arg1: memref<128x128xbf16, #tpu.memory_space<vmem>>, %arg2: memref<1x128xf32, #tpu.memory_space<vmem>>, %arg3: memref<1x128xf32, #tpu.memory_space<vmem>>, %arg4: memref<128x128xf32, #tpu.memory_space<vmem>>) attributes {dimension_semantics = [#tpu.dimension_semantics<parallel>], iteration_bounds = array<i64: 1>, scalar_prefetch = 0 : i64, scratch_operands = 0 : i64, tpu.core_type = #tpu.core_type<tc>, window_params = [{transform_indices = @transform_0, window_bounds = array<i64: 128, 128>}, {pipeline_mode = #tpu.pipeline_mode<synchronous>, transform_indices = @transform_1, window_bounds = array<i64: 1, 128>}, {pipeline_mode = #tpu.pipeline_mode<synchronous>, transform_indices = @transform_2, window_bounds = array<i64: 1, 128>}, {transform_indices = @transform_3, window_bounds = array<i64: 128, 128>}]} {
    %c0 = arith.constant 0 : index
    %c0_0 = arith.constant 0 : index
    %0 = vector.load %arg1[%c0, %c0_0] : memref<128x128xbf16, #tpu.memory_space<vmem>>, vector<128x128xbf16>
    %1 = arith.extf %0 : vector<128x128xbf16> to vector<128x128xf32>
    %c0_1 = arith.constant 0 : index
    %c0_2 = arith.constant 0 : index
    %2 = vector.load %arg2[%c0_1, %c0_2] : memref<1x128xf32, #tpu.memory_space<vmem>>, vector<1x128xf32>
    %3 = vector.broadcast %2 : vector<1x128xf32> to vector<128x128xf32>
    %4 = arith.mulf %1, %3 : vector<128x128xf32>
    %c0_3 = arith.constant 0 : index
    %c0_4 = arith.constant 0 : index
    %5 = vector.load %arg3[%c0_3, %c0_4] : memref<1x128xf32, #tpu.memory_space<vmem>>, vector<1x128xf32>
    %6 = vector.broadcast %5 : vector<1x128xf32> to vector<128x128xf32>
    %7 = arith.addf %4, %6 : vector<128x128xf32>
    %cst = arith.constant 0.000000e+00 : f32
    %8 = vector.broadcast %cst : f32 to vector<128x128xf32>
    %9 = arith.maximumf %7, %8 : vector<128x128xf32>
    %c0_5 = arith.constant 0 : index
    %c0_6 = arith.constant 0 : index
    %10 = vector.load %arg4[%c0_5, %c0_6] : memref<128x128xf32, #tpu.memory_space<vmem>>, vector<128x128xf32>
    tpu.vector_store %arg4[%c0_5, %c0_6], %9 {strides = array<i32>} : memref<128x128xf32, #tpu.memory_space<vmem>>, vector<128x128xf32>,
    return
  }
  func.func @transform_0(%arg0: i32) -> (i32, i32) {
    %c0_i32 = arith.constant 0 : i32
    %c0_i32_0 = arith.constant 0 : i32
    return %arg0, %c0_i32 : i32, i32
  }
  func.func @transform_1(%arg0: i32) -> (i32, i32) {
    %c0_i32 = arith.constant 0 : i32
    %c0_i32_0 = arith.constant 0 : i32
    %c0_i32_1 = arith.constant 0 : i32
    return %c0_i32, %c0_i32_0 : i32, i32
  }
  func.func @transform_2(%arg0: i32) -> (i32, i32) {
    %c0_i32 = arith.constant 0 : i32
    %c0_i32_0 = arith.constant 0 : i32
    %c0_i32_1 = arith.constant 0 : i32
    return %c0_i32, %c0_i32_0 : i32, i32
  }
  func.func @transform_3(%arg0: i32) -> (i32, i32) {
    %c0_i32 = arith.constant 0 : i32
    %c0_i32_0 = arith.constant 0 : i32
    return %arg0, %c0_i32 : i32, i32
  }
}

module attributes {stable_mosaic.version = 11 : i64} {
  func.func @_bn_relu_add_kernel(%arg0: i32, %arg1: memref<128x128xbf16, #tpu.memory_space<vmem>>, %arg2: memref<1x128xf32, #tpu.memory_space<vmem>>, %arg3: memref<1x128xf32, #tpu.memory_space<vmem>>, %arg4: memref<128x128xf32, #tpu.memory_space<vmem>>, %arg5: memref<128x128xf32, #tpu.memory_space<vmem>>) attributes {dimension_semantics = [#tpu.dimension_semantics<parallel>], iteration_bounds = array<i64: 1>, scalar_prefetch = 0 : i64, scratch_operands = 0 : i64, tpu.core_type = #tpu.core_type<tc>, window_params = [{transform_indices = @transform_0, window_bounds = array<i64: 128, 128>}, {pipeline_mode = #tpu.pipeline_mode<synchronous>, transform_indices = @transform_1, window_bounds = array<i64: 1, 128>}, {pipeline_mode = #tpu.pipeline_mode<synchronous>, transform_indices = @transform_2, window_bounds = array<i64: 1, 128>}, {transform_indices = @transform_3, window_bounds = array<i64: 128, 128>}, {transform_indices = @transform_4, window_bounds = array<i64: 128, 128>}]} {
    %c0 = arith.constant 0 : index
    %c0_0 = arith.constant 0 : index
    %0 = vector.load %arg1[%c0, %c0_0] : memref<128x128xbf16, #tpu.memory_space<vmem>>, vector<128x128xbf16>
    %1 = arith.extf %0 : vector<128x128xbf16> to vector<128x128xf32>
    %c0_1 = arith.constant 0 : index
    %c0_2 = arith.constant 0 : index
    %2 = vector.load %arg2[%c0_1, %c0_2] : memref<1x128xf32, #tpu.memory_space<vmem>>, vector<1x128xf32>
    %3 = vector.broadcast %2 : vector<1x128xf32> to vector<128x128xf32>
    %4 = arith.mulf %1, %3 : vector<128x128xf32>
    %c0_3 = arith.constant 0 : index
    %c0_4 = arith.constant 0 : index
    %5 = vector.load %arg3[%c0_3, %c0_4] : memref<1x128xf32, #tpu.memory_space<vmem>>, vector<1x128xf32>
    %6 = vector.broadcast %5 : vector<1x128xf32> to vector<128x128xf32>
    %7 = arith.addf %4, %6 : vector<128x128xf32>
    %cst = arith.constant 0.000000e+00 : f32
    %8 = vector.broadcast %cst : f32 to vector<128x128xf32>
    %9 = arith.maximumf %7, %8 : vector<128x128xf32>
    %c0_5 = arith.constant 0 : index
    %c0_6 = arith.constant 0 : index
    %10 = vector.load %arg4[%c0_5, %c0_6] : memref<128x128xf32, #tpu.memory_space<vmem>>, vector<128x128xf32>
    %11 = arith.addf %9, %10 : vector<128x128xf32>
    %c0_7 = arith.constant 0 : index
    %c0_8 = arith.constant 0 : index
    %12 = vector.load %arg5[%c0_7, %c0_8] : memref<128x128xf32, #tpu.memory_space<vmem>>, vector<128x128xf32>
    tpu.vector_store %arg5[%c0_7, %c0_8], %11 {strides = array<i32>} : memref<128x128xf32, #tpu.memory_space<vmem>>, vector<128x128xf32>,
    return
  }
  func.func @transform_0(%arg0: i32) -> (i32, i32) {
    %c0_i32 = arith.constant 0 : i32
    %c0_i32_0 = arith.constant 0 : i32
    return %arg0, %c0_i32 : i32, i32
  }
  func.func @transform_1(%arg0: i32) -> (i32, i32) {
    %c0_i32 = arith.constant 0 : i32
    %c0_i32_0 = arith.constant 0 : i32
    %c0_i32_1 = arith.constant 0 : i32
    return %c0_i32, %c0_i32_0 : i32, i32
  }
  func.func @transform_2(%arg0: i32) -> (i32, i32) {
    %c0_i32 = arith.constant 0 : i32
    %c0_i32_0 = arith.constant 0 : i32
    %c0_i32_1 = arith.constant 0 : i32
    return %c0_i32, %c0_i32_0 : i32, i32
  }
  func.func @transform_3(%arg0: i32) -> (i32, i32) {
    %c0_i32 = arith.constant 0 : i32
    %c0_i32_0 = arith.constant 0 : i32
    return %arg0, %c0_i32 : i32, i32
  }
  func.func @transform_4(%arg0: i32) -> (i32, i32) {
    %c0_i32 = arith.constant 0 : i32
    %c0_i32_0 = arith.constant 0 : i32
    return %arg0, %c0_i32 : i32, i32
  }
}

</mosaic_0001>

<bundles_post_ra>
// kernel: resnet_bottleneck_forward.11
= control target key start
LH: loop header
LB: loop body
LE: loop exit
PB: predicated region body
PF: predicated region fallthrough
CT: control target
= control target key end

     0   :  { %s1502_s0 = inlined_call_operand.vmem [shape: bf16[512,128], index: 0, kind: input, shape index: {}]   ;;  %s1503_s1 = inlined_call_operand.vmem [shape: f32[1,128], index: 1, kind: input, shape index: {}]   ;;  %s1504_s2 = inlined_call_operand.vmem [shape: f32[1,128], index: 2, kind: input, shape index: {}]   ;;  %s1505_s3 = inlined_call_operand.vmem [shape: bf16[512,128], index: 3, kind: output, shape index: {}]  }
   0x1   :  { %v803_v0 = vld [vmem:[%s1502_s0] sm:$0xff]   ;;  %v1090_v4 = vld [vmem:[%s1502_s0 + $0x8] sm:$0xff]   ;;  %v1091_v5 = vld [vmem:[%s1502_s0 + $0x10] sm:$0xff]  }
   0x2   :  { %v1178_v1 = vld [vmem:[%s1503_s1] ss:$0 sm:$0xff]  ;;  %v804_v2 = vunpack.c.l.bf16 %v803_v0  ;;  %v805_v3 = vunpack.c.h.bf16 %v803_v0  ;;  %v1092_v6 = vld [vmem:[%s1502_s0 + $0x18] sm:$0xff]   ;;  %v808_v8 = vunpack.c.l.bf16 %v1090_v4  ;;  %v809_v9 = vunpack.c.h.bf16 %v1090_v4  ;;  %v1094_v33 = vld [vmem:[%s1502_s0 + $0x28] sm:$0xff]  }
   0x3   :  { %v1192_v7 = vld [vmem:[%s1504_s2] ss:$0 sm:$0xff]  ;;  %v812_v10 = vunpack.c.l.bf16 %v1091_v5  ;;  %v813_v11 = vunpack.c.h.bf16 %v1091_v5  ;;  %v816_v14 = vunpack.c.l.bf16 %v1092_v6  ;;  %v817_v15 = vunpack.c.h.bf16 %v1092_v6  ;;  %v1095_v38 = vld [vmem:[%s1502_s0 + $0x30] sm:$0xff]   ;;  %v1096_v43 = vld [vmem:[%s1502_s0 + $0x38] sm:$0xff]  }
   0x4   :  { %v149_v12 = vmul.f32 %v804_v2, %v1178_v1  ;;  %v150_v13 = vmul.f32 %v805_v3, %v1178_v1  ;;  %v151_v16 = vmul.f32 %v808_v8, %v1178_v1  ;;  %v152_v17 = vmul.f32 %v809_v9, %v1178_v1  ;;  %v1093_v28 = vld [vmem:[%s1502_s0 + $0x20] sm:$0xff]  }
   0x5   :  { %v153_v18 = vmul.f32 %v812_v10, %v1178_v1  ;;  %v154_v19 = vmul.f32 %v813_v11, %v1178_v1  ;;  %v155_v22 = vmul.f32 %v816_v14, %v1178_v1  ;;  %v156_v23 = vmul.f32 %v817_v15, %v1178_v1  ;;  %v1097_v0 = vld [vmem:[%s1502_s0 + $0x40] sm:$0xff]   ;;  %v1098_v11 = vld [vmem:[%s1502_s0 + $0x48] sm:$0xff]  }
   0x6   :  { %v220_v20 = vadd.f32 %v1192_v7, %v149_v12  ;;  %v221_v21 = vadd.f32 %v1192_v7, %v150_v13  ;;  %v222_v24 = vadd.f32 %v1192_v7, %v151_v16  ;;  %v223_v25 = vadd.f32 %v1192_v7, %v152_v17  ;;  %v1099_v16 = vld [vmem:[%s1502_s0 + $0x50] sm:$0xff]  }
   0x7   :  { %v224_v26 = vadd.f32 %v1192_v7, %v153_v18  ;;  %v225_v27 = vadd.f32 %v1192_v7, %v154_v19  ;;  %v226_v31 = vadd.f32 %v1192_v7, %v155_v22  ;;  %v227_v32 = vadd.f32 %v1192_v7, %v156_v23 }
   0x8   :  { %v284_v29 = vmax.f32 %v220_v20, 0.0  ;;  %v285_v30 = vmax.f32 %v221_v21, 0.0  ;;  %v286_v34 = vmax.f32 %v222_v24, 0.0  ;;  %v287_v35 = vmax.f32 %v223_v25, 0.0  ;;  %v1100_v25 = vld [vmem:[%s1502_s0 + $0x58] sm:$0xff]  }
   0x9   :  { %v288_v36 = vmax.f32 %v224_v26, 0.0  ;;  %v289_v37 = vmax.f32 %v225_v27, 0.0  ;;  %v290_v40 = vmax.f32 %v226_v31, 0.0  ;;  %v291_v41 = vmax.f32 %v227_v32, 0.0 }
   0xa   :  { %v933_v39 = vpack.c.bf16 %v285_v30, %v284_v29  ;;  %v820_v42 = vunpack.c.l.bf16 %v1093_v28  ;;  %v938_v44 = vpack.c.bf16 %v287_v35, %v286_v34  ;;  %v821_v46 = vunpack.c.h.bf16 %v1093_v28 }
   0xb   :  { %v943_v45 = vpack.c.bf16 %v289_v37, %v288_v36  ;;  %v824_v47 = vunpack.c.l.bf16 %v1094_v33  ;;  %v948_v48 = vpack.c.bf16 %v291_v41, %v290_v40  ;;  %v825_v50 = vunpack.c.h.bf16 %v1094_v33 }
   0xc   :  { %934 = vst [vmem:[%s1505_s3] sm:$0xff] %v933_v39   ;;  %v157_v49 = vmul.f32 %v820_v42, %v1178_v1  ;;  %v828_v51 = vunpack.c.l.bf16 %v1095_v38  ;;  %1121 = vst [vmem:[%s1505_s3 + $0x8] sm:$0xff] %v938_v44   ;;  %v158_v52 = vmul.f32 %v821_v46, %v1178_v1  ;;  %v829_v54 = vunpack.c.h.bf16 %v1095_v38  ;;  %v1101_v38 = vld [vmem:[%s1502_s0 + $0x60] sm:$0xff]  }
   0xd   :  { %1122 = vst [vmem:[%s1505_s3 + $0x10] sm:$0xff] %v943_v45   ;;  %v159_v53 = vmul.f32 %v824_v47, %v1178_v1  ;;  %v832_v55 = vunpack.c.l.bf16 %v1096_v43  ;;  %1123 = vst [vmem:[%s1505_s3 + $0x18] sm:$0xff] %v948_v48   ;;  %v160_v57 = vmul.f32 %v825_v50, %v1178_v1  ;;  %v833_v59 = vunpack.c.h.bf16 %v1096_v43 }
   0xe   :  { %v228_v56 = vadd.f32 %v1192_v7, %v157_v49  ;;  %v161_v58 = vmul.f32 %v828_v51, %v1178_v1  ;;  %v229_v60 = vadd.f32 %v1192_v7, %v158_v52  ;;  %v162_v62 = vmul.f32 %v829_v54, %v1178_v1  ;;  %v1102_v51 = vld [vmem:[%s1502_s0 + $0x68] sm:$0xff]  }
   0xf   :  { %v230_v61 = vadd.f32 %v1192_v7, %v159_v53  ;;  %v163_v63 = vmul.f32 %v832_v55, %v1178_v1  ;;  %v231_v3 = vadd.f32 %v1192_v7, %v160_v57  ;;  %v164_v5 = vmul.f32 %v833_v59, %v1178_v1 }
  0x10   :  { %v292_v2 = vmax.f32 %v228_v56, 0.0  ;;  %v232_v4 = vadd.f32 %v1192_v7, %v161_v58  ;;  %v293_v6 = vmax.f32 %v229_v60, 0.0  ;;  %v233_v9 = vadd.f32 %v1192_v7, %v162_v62  ;;  %v1103_v60 = vld [vmem:[%s1502_s0 + $0x70] sm:$0xff]  }
  0x11   :  { %v294_v8 = vmax.f32 %v230_v61, 0.0  ;;  %v234_v10 = vadd.f32 %v1192_v7, %v163_v63  ;;  %v295_v12 = vmax.f32 %v231_v3, 0.0  ;;  %v235_v14 = vadd.f32 %v1192_v7, %v164_v5 }
  0x12   :  { %v296_v13 = vmax.f32 %v232_v4, 0.0  ;;  %v836_v15 = vunpack.c.l.bf16 %v1097_v0  ;;  %v953_v17 = vpack.c.bf16 %v293_v6, %v292_v2  ;;  %v297_v18 = vmax.f32 %v233_v9, 0.0  ;;  %v1104_v2 = vld [vmem:[%s1502_s0 + $0x78] sm:$0xff]  }
  0x13   :  { %v298_v19 = vmax.f32 %v234_v10, 0.0  ;;  %v837_v20 = vunpack.c.h.bf16 %v1097_v0  ;;  %v958_v21 = vpack.c.bf16 %v295_v12, %v294_v8  ;;  %v299_v22 = vmax.f32 %v235_v14, 0.0  ;;  %v1105_v12 = vld [vmem:[%s1502_s0 + $0x80] sm:$0xff]  }
  0x14   :  { %v165_v23 = vmul.f32 %v836_v15, %v1178_v1  ;;  %v840_v24 = vunpack.c.l.bf16 %v1098_v11  ;;  %1124 = vst [vmem:[%s1505_s3 + $0x20] sm:$0xff] %v953_v17   ;;  %v963_v26 = vpack.c.bf16 %v297_v18, %v296_v13  ;;  %v841_v28 = vunpack.c.h.bf16 %v1098_v11 }
  0x15   :  { %v166_v27 = vmul.f32 %v837_v20, %v1178_v1  ;;  %v844_v29 = vunpack.c.l.bf16 %v1099_v16  ;;  %1125 = vst [vmem:[%s1505_s3 + $0x28] sm:$0xff] %v958_v21   ;;  %v968_v30 = vpack.c.bf16 %v299_v22, %v298_v19  ;;  %v845_v33 = vunpack.c.h.bf16 %v1099_v16 }
  0x16   :  { %v236_v31 = vadd.f32 %v1192_v7, %v165_v23  ;;  %v167_v32 = vmul.f32 %v840_v24, %v1178_v1  ;;  %1126 = vst [vmem:[%s1505_s3 + $0x30] sm:$0xff] %v963_v26   ;;  %v168_v35 = vmul.f32 %v841_v28, %v1178_v1  ;;  %v848_v37 = vunpack.c.l.bf16 %v1100_v25 }
  0x17   :  { %v237_v34 = vadd.f32 %v1192_v7, %v166_v27  ;;  %v169_v36 = vmul.f32 %v844_v29, %v1178_v1  ;;  %1127 = vst [vmem:[%s1505_s3 + $0x38] sm:$0xff] %v968_v30   ;;  %v170_v41 = vmul.f32 %v845_v33, %v1178_v1  ;;  %v849_v42 = vunpack.c.h.bf16 %v1100_v25  ;;  %v1106_v29 = vld [vmem:[%s1502_s0 + $0x88] sm:$0xff]  }
  0x18   :  { %v300_v39 = vmax.f32 %v236_v31, 0.0  ;;  %v238_v40 = vadd.f32 %v1192_v7, %v167_v32  ;;  %v239_v44 = vadd.f32 %v1192_v7, %v168_v35  ;;  %v171_v46 = vmul.f32 %v848_v37, %v1178_v1 }
  0x19   :  { %v301_v43 = vmax.f32 %v237_v34, 0.0  ;;  %v240_v45 = vadd.f32 %v1192_v7, %v169_v36  ;;  %v241_v48 = vadd.f32 %v1192_v7, %v170_v41  ;;  %v172_v49 = vmul.f32 %v849_v42, %v1178_v1  ;;  %v1107_v34 = vld [vmem:[%s1502_s0 + $0x90] sm:$0xff]  }
  0x1a   :  { %v302_v47 = vmax.f32 %v238_v40, 0.0  ;;  %v852_v50 = vunpack.c.l.bf16 %v1101_v38  ;;  %v303_v53 = vmax.f32 %v239_v44, 0.0  ;;  %v242_v55 = vadd.f32 %v1192_v7, %v171_v46 }
  0x1b   :  { %v973_v52 = vpack.c.bf16 %v301_v43, %v300_v39  ;;  %v304_v54 = vmax.f32 %v240_v45, 0.0  ;;  %v305_v56 = vmax.f32 %v241_v48, 0.0  ;;  %v243_v57 = vadd.f32 %v1192_v7, %v172_v49  ;;  %v1108_v43 = vld [vmem:[%s1502_s0 + $0x98] sm:$0xff]  }
  0x1c   :  { %v853_v58 = vunpack.c.h.bf16 %v1101_v38  ;;  %v173_v59 = vmul.f32 %v852_v50, %v1178_v1  ;;  %v978_v61 = vpack.c.bf16 %v303_v53, %v302_v47  ;;  %v306_v62 = vmax.f32 %v242_v55, 0.0 }
  0x1d   :  { %1128 = vst [vmem:[%s1505_s3 + $0x40] sm:$0xff] %v973_v52   ;;  %v856_v63 = vunpack.c.l.bf16 %v1102_v51  ;;  %v857_v0 = vunpack.c.h.bf16 %v1102_v51  ;;  %v983_v3 = vpack.c.bf16 %v305_v56, %v304_v54  ;;  %v307_v4 = vmax.f32 %v243_v57, 0.0  ;;  %v1109_v56 = vld [vmem:[%s1502_s0 + $0xa0] sm:$0xff]  }
  0x1e   :  { %v174_v5 = vmul.f32 %v853_v58, %v1178_v1  ;;  %v244_v6 = vadd.f32 %v1192_v7, %v173_v59  ;;  %1129 = vst [vmem:[%s1505_s3 + $0x48] sm:$0xff] %v978_v61   ;;  %v860_v10 = vunpack.c.l.bf16 %v1103_v60  ;;  %v861_v11 = vunpack.c.h.bf16 %v1103_v60 }
  0x1f   :  { %v175_v8 = vmul.f32 %v856_v63, %v1178_v1  ;;  %v176_v9 = vmul.f32 %v857_v0, %v1178_v1  ;;  %1130 = vst [vmem:[%s1505_s3 + $0x50] sm:$0xff] %v983_v3   ;;  %v988_v13 = vpack.c.bf16 %v307_v4, %v306_v62  ;;  %v864_v16 = vunpack.c.l.bf16 %v1104_v2 }
  0x20   :  { %v245_v14 = vadd.f32 %v1192_v7, %v174_v5  ;;  %v308_v15 = vmax.f32 %v244_v6, 0.0  ;;  %v177_v19 = vmul.f32 %v860_v10, %v1178_v1  ;;  %v178_v20 = vmul.f32 %v861_v11, %v1178_v1 }
  0x21   :  { %v246_v17 = vadd.f32 %v1192_v7, %v175_v8  ;;  %v247_v18 = vadd.f32 %v1192_v7, %v176_v9  ;;  %1131 = vst [vmem:[%s1505_s3 + $0x58] sm:$0xff] %v988_v13   ;;  %v865_v22 = vunpack.c.h.bf16 %v1104_v2  ;;  %v179_v23 = vmul.f32 %v864_v16, %v1178_v1  ;;  %v1110_v2 = vld [vmem:[%s1502_s0 + $0xa8] sm:$0xff]   ;;  %v1111_v16 = vld [vmem:[%s1502_s0 + $0xb0] sm:$0xff]  }
  0x22   :  { %v309_v21 = vmax.f32 %v245_v14, 0.0  ;;  %v868_v24 = vunpack.c.l.bf16 %v1105_v12  ;;  %v248_v27 = vadd.f32 %v1192_v7, %v177_v19  ;;  %v249_v28 = vadd.f32 %v1192_v7, %v178_v20 }
  0x23   :  { %v310_v25 = vmax.f32 %v246_v17, 0.0  ;;  %v311_v26 = vmax.f32 %v247_v18, 0.0  ;;  %v180_v31 = vmul.f32 %v865_v22, %v1178_v1  ;;  %v250_v32 = vadd.f32 %v1192_v7, %v179_v23 }
  0x24   :  { %v993_v30 = vpack.c.bf16 %v309_v21, %v308_v15  ;;  %v869_v33 = vunpack.c.h.bf16 %v1105_v12  ;;  %v312_v36 = vmax.f32 %v248_v27, 0.0  ;;  %v313_v37 = vmax.f32 %v249_v28, 0.0  ;;  %v1112_v21 = vld [vmem:[%s1502_s0 + $0xb8] sm:$0xff]  }
  0x25   :  { %v998_v35 = vpack.c.bf16 %v311_v26, %v310_v25  ;;  %v181_v38 = vmul.f32 %v868_v24, %v1178_v1  ;;  %v251_v39 = vadd.f32 %v1192_v7, %v180_v31  ;;  %v314_v40 = vmax.f32 %v250_v32, 0.0 }
  0x26   :  { %1132 = vst [vmem:[%s1505_s3 + $0x60] sm:$0xff] %v993_v30   ;;  %v182_v41 = vmul.f32 %v869_v33, %v1178_v1  ;;  %v872_v42 = vunpack.c.l.bf16 %v1106_v29  ;;  %v1003_v44 = vpack.c.bf16 %v313_v37, %v312_v36  ;;  %v873_v46 = vunpack.c.h.bf16 %v1106_v29 }
  0x27   :  { %1133 = vst [vmem:[%s1505_s3 + $0x68] sm:$0xff] %v998_v35   ;;  %v252_v45 = vadd.f32 %v1192_v7, %v181_v38  ;;  %v876_v47 = vunpack.c.l.bf16 %v1107_v34  ;;  %v315_v48 = vmax.f32 %v251_v39, 0.0  ;;  %v877_v51 = vunpack.c.h.bf16 %v1107_v34  ;;  %v1113_v34 = vld [vmem:[%s1502_s0 + $0xc0] sm:$0xff]  }
  0x28   :  { %v253_v49 = vadd.f32 %v1192_v7, %v182_v41  ;;  %v183_v50 = vmul.f32 %v872_v42, %v1178_v1  ;;  %1134 = vst [vmem:[%s1505_s3 + $0x70] sm:$0xff] %v1003_v44   ;;  %v184_v53 = vmul.f32 %v873_v46, %v1178_v1  ;;  %v880_v55 = vunpack.c.l.bf16 %v1108_v43 }
  0x29   :  { %v316_v52 = vmax.f32 %v252_v45, 0.0  ;;  %v185_v54 = vmul.f32 %v876_v47, %v1178_v1  ;;  %v1008_v57 = vpack.c.bf16 %v315_v48, %v314_v40  ;;  %v186_v60 = vmul.f32 %v877_v51, %v1178_v1  ;;  %v1114_v47 = vld [vmem:[%s1502_s0 + $0xc8] sm:$0xff]  }
  0x2a   :  { %v317_v58 = vmax.f32 %v253_v49, 0.0  ;;  %v254_v59 = vadd.f32 %v1192_v7, %v183_v50  ;;  %v255_v61 = vadd.f32 %v1192_v7, %v184_v53  ;;  %v881_v63 = vunpack.c.h.bf16 %v1108_v43 }
  0x2b   :  { %v256_v62 = vadd.f32 %v1192_v7, %v185_v54  ;;  %v187_v0 = vmul.f32 %v880_v55, %v1178_v1  ;;  %1135 = vst [vmem:[%s1505_s3 + $0x78] sm:$0xff] %v1008_v57   ;;  %v257_v5 = vadd.f32 %v1192_v7, %v186_v60  ;;  %v884_v6 = vunpack.c.l.bf16 %v1109_v56 }
  0x2c   :  { %v1013_v3 = vpack.c.bf16 %v317_v58, %v316_v52  ;;  %v318_v4 = vmax.f32 %v254_v59, 0.0  ;;  %v319_v8 = vmax.f32 %v255_v61, 0.0  ;;  %v188_v10 = vmul.f32 %v881_v63, %v1178_v1  ;;  %v1115_v52 = vld [vmem:[%s1502_s0 + $0xd0] sm:$0xff]   ;;  %v1116_v61 = vld [vmem:[%s1502_s0 + $0xd8] sm:$0xff]  }
  0x2d   :  { %v320_v9 = vmax.f32 %v256_v62, 0.0  ;;  %v258_v11 = vadd.f32 %v1192_v7, %v187_v0  ;;  %v321_v12 = vmax.f32 %v257_v5, 0.0  ;;  %v885_v13 = vunpack.c.h.bf16 %v1109_v56 }
  0x2e   :  { %1136 = vst [vmem:[%s1505_s3 + $0x80] sm:$0xff] %v1013_v3   ;;  %v189_v14 = vmul.f32 %v884_v6, %v1178_v1  ;;  %v888_v15 = vunpack.c.l.bf16 %v1110_v2  ;;  %v1018_v17 = vpack.c.bf16 %v319_v8, %v318_v4  ;;  %v259_v18 = vadd.f32 %v1192_v7, %v188_v10 }
  0x2f   :  { %v322_v19 = vmax.f32 %v258_v11, 0.0  ;;  %v889_v20 = vunpack.c.h.bf16 %v1110_v2  ;;  %v1023_v22 = vpack.c.bf16 %v321_v12, %v320_v9  ;;  %v190_v23 = vmul.f32 %v885_v13, %v1178_v1  ;;  %v1117_v12 = vld [vmem:[%s1502_s0 + $0xe0] sm:$0xff]  }
  0x30   :  { %v260_v24 = vadd.f32 %v1192_v7, %v189_v14  ;;  %v191_v25 = vmul.f32 %v888_v15, %v1178_v1  ;;  %1137 = vst [vmem:[%s1505_s3 + $0x88] sm:$0xff] %v1018_v17   ;;  %v323_v26 = vmax.f32 %v259_v18, 0.0  ;;  %v892_v28 = vunpack.c.l.bf16 %v1111_v16 }
  0x31   :  { %v192_v27 = vmul.f32 %v889_v20, %v1178_v1  ;;  %v893_v29 = vunpack.c.h.bf16 %v1111_v16  ;;  %1138 = vst [vmem:[%s1505_s3 + $0x90] sm:$0xff] %v1023_v22   ;;  %v261_v30 = vadd.f32 %v1192_v7, %v190_v23  ;;  %v896_v33 = vunpack.c.l.bf16 %v1112_v21 }
  0x32   :  { %v324_v31 = vmax.f32 %v260_v24, 0.0  ;;  %v262_v32 = vadd.f32 %v1192_v7, %v191_v25  ;;  %v1028_v35 = vpack.c.bf16 %v323_v26, %v322_v19  ;;  %v193_v37 = vmul.f32 %v892_v28, %v1178_v1 }
  0x33   :  { %v263_v36 = vadd.f32 %v1192_v7, %v192_v27  ;;  %v194_v38 = vmul.f32 %v893_v29, %v1178_v1  ;;  %v325_v39 = vmax.f32 %v261_v30, 0.0  ;;  %v897_v41 = vunpack.c.h.bf16 %v1112_v21  ;;  %v1118_v21 = vld [vmem:[%s1502_s0 + $0xe8] sm:$0xff]  }
  0x34   :  { %v326_v40 = vmax.f32 %v262_v32, 0.0  ;;  %v195_v42 = vmul.f32 %v896_v33, %v1178_v1  ;;  %1139 = vst [vmem:[%s1505_s3 + $0x98] sm:$0xff] %v1028_v35   ;;  %v264_v44 = vadd.f32 %v1192_v7, %v193_v37  ;;  %v900_v46 = vunpack.c.l.bf16 %v1113_v34 }
  0x35   :  { %v327_v43 = vmax.f32 %v263_v36, 0.0  ;;  %v265_v45 = vadd.f32 %v1192_v7, %v194_v38  ;;  %v1033_v48 = vpack.c.bf16 %v325_v39, %v324_v31  ;;  %v196_v49 = vmul.f32 %v897_v41, %v1178_v1  ;;  %v1120_v39 = vld [vmem:[%s1502_s0 + $0xf8] sm:$0xff]  }
  0x36   :  { %v266_v50 = vadd.f32 %v1192_v7, %v195_v42  ;;  %v901_v51 = vunpack.c.h.bf16 %v1113_v34  ;;  %v328_v54 = vmax.f32 %v264_v44, 0.0  ;;  %v197_v56 = vmul.f32 %v900_v46, %v1178_v1  ;;  %v1119_v34 = vld [vmem:[%s1502_s0 + $0xf0] sm:$0xff]  }
  0x37   :  { %v1038_v53 = vpack.c.bf16 %v327_v43, %v326_v40  ;;  %v329_v55 = vmax.f32 %v265_v45, 0.0  ;;  %1140 = vst [vmem:[%s1505_s3 + $0xa0] sm:$0xff] %v1033_v48   ;;  %v267_v57 = vadd.f32 %v1192_v7, %v196_v49  ;;  %v904_v60 = vunpack.c.l.bf16 %v1114_v47 }
  0x38   :  { %v330_v58 = vmax.f32 %v266_v50, 0.0  ;;  %v198_v59 = vmul.f32 %v901_v51, %v1178_v1  ;;  %v268_v63 = vadd.f32 %v1192_v7, %v197_v56  ;;  %v905_v0 = vunpack.c.h.bf16 %v1114_v47 }
  0x39   :  { %1141 = vst [vmem:[%s1505_s3 + $0xa8] sm:$0xff] %v1038_v53   ;;  %v1043_v62 = vpack.c.bf16 %v329_v55, %v328_v54  ;;  %v908_v2 = vunpack.c.l.bf16 %v1115_v52  ;;  %v331_v3 = vmax.f32 %v267_v57, 0.0  ;;  %v199_v5 = vmul.f32 %v904_v60, %v1178_v1 }
  0x3a   :  { %v269_v4 = vadd.f32 %v1192_v7, %v198_v59  ;;  %v909_v6 = vunpack.c.h.bf16 %v1115_v52  ;;  %v332_v8 = vmax.f32 %v268_v63, 0.0  ;;  %v200_v9 = vmul.f32 %v905_v0, %v1178_v1 }
  0x3b   :  { %1142 = vst [vmem:[%s1505_s3 + $0xb0] sm:$0xff] %v1043_v62   ;;  %v201_v10 = vmul.f32 %v908_v2, %v1178_v1  ;;  %v912_v11 = vunpack.c.l.bf16 %v1116_v61  ;;  %v1048_v13 = vpack.c.bf16 %v331_v3, %v330_v58  ;;  %v270_v15 = vadd.f32 %v1192_v7, %v199_v5 }
  0x3c   :  { %v333_v14 = vmax.f32 %v269_v4, 0.0  ;;  %v202_v16 = vmul.f32 %v909_v6, %v1178_v1  ;;  %v271_v17 = vadd.f32 %v1192_v7, %v200_v9  ;;  %v913_v19 = vunpack.c.h.bf16 %v1116_v61 }
  0x3d   :  { %v272_v18 = vadd.f32 %v1192_v7, %v201_v10  ;;  %v203_v20 = vmul.f32 %v912_v11, %v1178_v1  ;;  %1143 = vst [vmem:[%s1505_s3 + $0xb8] sm:$0xff] %v1048_v13   ;;  %v334_v23 = vmax.f32 %v270_v15, 0.0  ;;  %v916_v25 = vunpack.c.l.bf16 %v1117_v12 }
  0x3e   :  { %v1053_v22 = vpack.c.bf16 %v333_v14, %v332_v8  ;;  %v273_v24 = vadd.f32 %v1192_v7, %v202_v16  ;;  %v335_v26 = vmax.f32 %v271_v17, 0.0  ;;  %v204_v28 = vmul.f32 %v913_v19, %v1178_v1 }
  0x3f   :  { %v336_v27 = vmax.f32 %v272_v18, 0.0  ;;  %v274_v29 = vadd.f32 %v1192_v7, %v203_v20  ;;  %v917_v31 = vunpack.c.h.bf16 %v1117_v12  ;;  %v205_v32 = vmul.f32 %v916_v25, %v1178_v1 }
  0x40   :  { %1144 = vst [vmem:[%s1505_s3 + $0xc0] sm:$0xff] %v1053_v22   ;;  %v337_v30 = vmax.f32 %v273_v24, 0.0  ;;  %v920_v33 = vunpack.c.l.bf16 %v1118_v21  ;;  %v1058_v35 = vpack.c.bf16 %v335_v26, %v334_v23  ;;  %v275_v36 = vadd.f32 %v1192_v7, %v204_v28 }
  0x41   :  { %v338_v37 = vmax.f32 %v274_v29, 0.0  ;;  %v921_v38 = vunpack.c.h.bf16 %v1118_v21  ;;  %v206_v41 = vmul.f32 %v917_v31, %v1178_v1  ;;  %v276_v42 = vadd.f32 %v1192_v7, %v205_v32 }
  0x42   :  { %v1063_v40 = vpack.c.bf16 %v337_v30, %v336_v27  ;;  %v207_v43 = vmul.f32 %v920_v33, %v1178_v1  ;;  %1145 = vst [vmem:[%s1505_s3 + $0xc8] sm:$0xff] %v1058_v35   ;;  %v339_v44 = vmax.f32 %v275_v36, 0.0  ;;  %v924_v46 = vunpack.c.l.bf16 %v1119_v34 }
  0x43   :  { %v208_v45 = vmul.f32 %v921_v38, %v1178_v1  ;;  %v925_v47 = vunpack.c.h.bf16 %v1119_v34  ;;  %v277_v48 = vadd.f32 %v1192_v7, %v206_v41  ;;  %v340_v49 = vmax.f32 %v276_v42, 0.0 }
  0x44   :  { %1146 = vst [vmem:[%s1505_s3 + $0xd0] sm:$0xff] %v1063_v40   ;;  %v278_v50 = vadd.f32 %v1192_v7, %v207_v43  ;;  %v928_v51 = vunpack.c.l.bf16 %v1120_v39  ;;  %v1068_v52 = vpack.c.bf16 %v339_v44, %v338_v37  ;;  %v209_v54 = vmul.f32 %v924_v46, %v1178_v1 }
  0x45   :  { %v279_v53 = vadd.f32 %v1192_v7, %v208_v45  ;;  %v210_v55 = vmul.f32 %v925_v47, %v1178_v1  ;;  %v341_v56 = vmax.f32 %v277_v48, 0.0  ;;  %v929_v58 = vunpack.c.h.bf16 %v1120_v39 }
  0x46   :  { %v342_v57 = vmax.f32 %v278_v50, 0.0  ;;  %v211_v59 = vmul.f32 %v928_v51, %v1178_v1  ;;  %1147 = vst [vmem:[%s1505_s3 + $0xd8] sm:$0xff] %v1068_v52   ;;  %v280_v61 = vadd.f32 %v1192_v7, %v209_v54 }
  0x47   :  { %v343_v60 = vmax.f32 %v279_v53, 0.0  ;;  %v281_v62 = vadd.f32 %v1192_v7, %v210_v55  ;;  %v1073_v63 = vpack.c.bf16 %v341_v56, %v340_v49  ;;  %v212_v0 = vmul.f32 %v929_v58, %v1178_v1 }
  0x48   :  { %v282_v2 = vadd.f32 %v1192_v7, %v211_v59  ;;  %v344_v4 = vmax.f32 %v280_v61, 0.0 }
  0x49   :  { %v1078_v3 = vpack.c.bf16 %v343_v60, %v342_v57  ;;  %v345_v5 = vmax.f32 %v281_v62, 0.0  ;;  %1148 = vst [vmem:[%s1505_s3 + $0xe0] sm:$0xff] %v1073_v63   ;;  %v283_v6 = vadd.f32 %v1192_v7, %v212_v0 }
  0x4a   :  { %v346_v8 = vmax.f32 %v282_v2, 0.0 }
  0x4b   :  { %1149 = vst [vmem:[%s1505_s3 + $0xe8] sm:$0xff] %v1078_v3   ;;  %v1083_v9 = vpack.c.bf16 %v345_v5, %v344_v4  ;;  %v347_v10 = vmax.f32 %v283_v6, 0.0 }
  0x4d   :  { %1150 = vst [vmem:[%s1505_s3 + $0xf0] sm:$0xff] %v1083_v9   ;;  %v1088_v1 = vpack.c.bf16 %v347_v10, %v346_v8 }
  0x4f   :  { %1151 = vst [vmem:[%s1505_s3 + $0xf8] sm:$0xff] %v1088_v1  }

// kernel: resnet_bottleneck_forward.10
= control target key start
LH: loop header
LB: loop body
LE: loop exit
PB: predicated region body
PF: predicated region fallthrough
CT: control target
= control target key end

     0   :  { %vm378_vm0 = vcmask 130048   ;;  %s2457_s1 = inlined_call_operand.vmem [shape: bf16[16,128], index: 1, kind: input, shape index: {}]   ;;  %s2458_s0 = inlined_call_operand.vmem [shape: bf16[512,16], index: 0, kind: input, shape index: {}]   ;;  %s2459_s2 = inlined_call_operand.vmem [shape: bf16[512,128], index: 2, kind: output, shape index: {0}]   ;;  %s2460_s3 = inlined_call_operand.vmem [shape: f32[1,8,128], index: 3, kind: output, shape index: {1}]  }
   0x1   :  { %v1982_v0 = vld [vmem:[%s2457_s1] sm:$0xff]   ;;  %v1984_v2 = vld [vmem:[%s2458_s0 + $0x8] sm:$0xff]   ;;  %v1985_v3 = vld [vmem:[%s2458_s0 + $0x10] sm:$0xff]  }
   0x2   :  { %v1983_v1 = vld [vmem:[%s2458_s0] sm:$0xff]   ;;  %1914 = vmatprep.subr.bf16.mxu0 %v1982_v0  ;;  %1980 = vmatprep.subr.bf16.mxu1 %v1982_v0  ;;  %v1986_v4 = vld [vmem:[%s2458_s0 + $0x18] sm:$0xff]   ;;  %v1988_v6 = vld [vmem:[%s2458_s0 + $0x28] sm:$0xff]  }
   0x3   :  { %1915 = vmatpush3.bf16.msra.mxu0 %v1982_v0  ;;  %1916 = vmatprep.mubr.msk.bf16.mxu0 %vm378_vm0, %v1983_v1  ;;  %v1987_v5 = vld [vmem:[%s2458_s0 + $0x20] sm:$0xff]   ;;  %v1989_v7 = vld [vmem:[%s2458_s0 + $0x30] sm:$0xff]   ;;  %v2000_v9 = vld [vmem:[%s2458_s0 + $0x88] sm:$0xff]  }
   0x4   :  { %1981 = vmatpush3.bf16.msra.mxu1 %v1982_v0  ;;  %v1999_v8 = vld [vmem:[%s2458_s0 + $0x80] sm:$0xff]   ;;  %v2001_v10 = vld [vmem:[%s2458_s0 + $0x90] sm:$0xff]   ;;  %v2002_v11 = vld [vmem:[%s2458_s0 + $0x98] sm:$0xff]  }
   0x5   :  { %1948 = vmatprep.mubr.msk.bf16.mxu1 %vm378_vm0, %v1999_v8  ;;  %v2003_v12 = vld [vmem:[%s2458_s0 + $0xa0] sm:$0xff]   ;;  %v1990_v13 = vld [vmem:[%s2458_s0 + $0x38] sm:$0xff]   ;;  %v2004_v15 = vld [vmem:[%s2458_s0 + $0xa8] sm:$0xff]  }
   0x6   :  { %1917 = vmatmul.mubr.msk.bf16.vlgmr.msra.gmra.mxu0 %vm378_vm0, %v1984_v2  ;;  %v1991_v14 = vld [vmem:[%s2458_s0 + $0x40] sm:$0xff]   ;;  %v2005_v16 = vld [vmem:[%s2458_s0 + $0xb0] sm:$0xff]   ;;  %v1992_v17 = vld [vmem:[%s2458_s0 + $0x48] sm:$0xff]  }
   0x7   :  { %1920 = vmatprep.mubr.msk.bf16.mxu0 %vm378_vm0, %v1985_v3  ;;  %1949 = vmatmul.mubr.msk.bf16.vlgmr.msra.gmra.mxu1 %vm378_vm0, %v2000_v9  ;;  %v1993_v18 = vld [vmem:[%s2458_s0 + $0x50] sm:$0xff]   ;;  %v2006_v19 = vld [vmem:[%s2458_s0 + $0xb8] sm:$0xff]   ;;  %v2007_v20 = vld [vmem:[%s2458_s0 + $0xc0] sm:$0xff]  }
   0x8   :  { %1952 = vmatprep.mubr.msk.bf16.mxu1 %vm378_vm0, %v2001_v10  ;;  %v1994_v21 = vld [vmem:[%s2458_s0 + $0x58] sm:$0xff]   ;;  %v1995_v22 = vld [vmem:[%s2458_s0 + $0x60] sm:$0xff]   ;;  %v2008_v23 = vld [vmem:[%s2458_s0 + $0xc8] sm:$0xff]  }
   0x9   :  { %v2009_v24 = vld [vmem:[%s2458_s0 + $0xd0] sm:$0xff]   ;;  %v1996_v25 = vld [vmem:[%s2458_s0 + $0x68] sm:$0xff]   ;;  %v2010_v27 = vld [vmem:[%s2458_s0 + $0xd8] sm:$0xff]  }
   0xa   :  { %v1997_v26 = vld [vmem:[%s2458_s0 + $0x70] sm:$0xff]   ;;  %v2011_v28 = vld [vmem:[%s2458_s0 + $0xe0] sm:$0xff]   ;;  %v1998_v29 = vld [vmem:[%s2458_s0 + $0x78] sm:$0xff]  }
   0xb   :  { %v2012_v30 = vld [vmem:[%s2458_s0 + $0xe8] sm:$0xff]   ;;  %v2013_v31 = vld [vmem:[%s2458_s0 + $0xf0] sm:$0xff]   ;;  %v2014_v32 = vld [vmem:[%s2458_s0 + $0xf8] sm:$0xff]  }
   0xe   :  { %1921 = vmatmul.mubr.msk.bf16.gmra.mxu0 %vm378_vm0, %v1986_v4 }
   0xf   :  { %1924 = vmatprep.mubr.msk.bf16.mxu0 %vm378_vm0, %v1987_v5  ;;  %1953 = vmatmul.mubr.msk.bf16.gmra.mxu1 %vm378_vm0, %v2002_v11 }
  0x10   :  { %1956 = vmatprep.mubr.msk.bf16.mxu1 %vm378_vm0, %v2003_v12 }
  0x16   :  { %1925 = vmatmul.mubr.msk.bf16.gmra.mxu0 %vm378_vm0, %v1988_v6 }
  0x17   :  { %1928 = vmatprep.mubr.msk.bf16.mxu0 %vm378_vm0, %v1989_v7  ;;  %1957 = vmatmul.mubr.msk.bf16.gmra.mxu1 %vm378_vm0, %v2004_v15 }
  0x18   :  { %1960 = vmatprep.mubr.msk.bf16.mxu1 %vm378_vm0, %v2005_v16 }
  0x1e   :  { %1929 = vmatmul.mubr.msk.bf16.gmra.mxu0 %vm378_vm0, %v1990_v13 }
  0x1f   :  { %1932 = vmatprep.mubr.msk.bf16.mxu0 %vm378_vm0, %v1991_v14  ;;  %1961 = vmatmul.mubr.msk.bf16.gmra.mxu1 %vm378_vm0, %v2006_v19 }
  0x20   :  { %1964 = vmatprep.mubr.msk.bf16.mxu1 %vm378_vm0, %v2007_v20 }
  0x26   :  { %1933 = vmatmul.mubr.msk.bf16.gmra.mxu0 %vm378_vm0, %v1992_v17 }
  0x27   :  { %1936 = vmatprep.mubr.msk.bf16.mxu0 %vm378_vm0, %v1993_v18  ;;  %1965 = vmatmul.mubr.msk.bf16.gmra.mxu1 %vm378_vm0, %v2008_v23 }
  0x28   :  { %1968 = vmatprep.mubr.msk.bf16.mxu1 %vm378_vm0, %v2009_v24 }
  0x2e   :  { %1937 = vmatmul.mubr.msk.bf16.gmra.mxu0 %vm378_vm0, %v1994_v21 }
  0x2f   :  { %1940 = vmatprep.mubr.msk.bf16.mxu0 %vm378_vm0, %v1995_v22  ;;  %1969 = vmatmul.mubr.msk.bf16.gmra.mxu1 %vm378_vm0, %v2010_v27 }
  0x30   :  { %1972 = vmatprep.mubr.msk.bf16.mxu1 %vm378_vm0, %v2011_v28 }
  0x36   :  { %1941 = vmatmul.mubr.msk.bf16.gmra.mxu0 %vm378_vm0, %v1996_v25 }
  0x37   :  { %1944 = vmatprep.mubr.msk.bf16.mxu0 %vm378_vm0, %v1997_v26  ;;  %1973 = vmatmul.mubr.msk.bf16.gmra.mxu1 %vm378_vm0, %v2012_v30 }
  0x38   :  { %1976 = vmatprep.mubr.msk.bf16.mxu1 %vm378_vm0, %v2013_v31 }
  0x3e   :  { %1945 = vmatmul.mubr.msk.bf16.gmra.mxu0 %vm378_vm0, %v1998_v29 }
  0x3f   :  { %1977 = vmatmul.mubr.msk.bf16.gmra.mxu1 %vm378_vm0, %v2014_v32 }
  0xc6   :  { %v1918_v33 = vpop.f32.mrf.mxu0 }
  0xc7   :  { %v1350_v43 = vmul.f32 %v1918_v33, %v1918_v33  ;;  %v2172_v56 = vpop.f32.mrf.mxu1 }
  0xc8   :  { %v509_v34 = vpop.f32.mrf.mxu0 }
  0xc9   :  { %v1348_v38 = vmul.f32 %v509_v34, %v509_v34  ;;  %v2177_v62 = vpop.f32.mrf.mxu1 }
  0xca   :  { %v1919_v35 = vpop.f32.mrf.mxu0 }
  0xcb   :  { %v1698_v36 = vpack.c.bf16 %v1919_v35, %v1918_v33  ;;  %v1351_v47 = vmul.f32 %v1919_v35, %v1919_v35  ;;  %v2182_v3 = vpop.f32.mrf.mxu1 }
  0xcc   :  { %v512_v37 = vpop.f32.mrf.mxu0  ;;  %v1778_v7 = vpack.c.bf16 %v2182_v3, %v2172_v56 }
  0xcd   :  { %1850 = vst [vmem:[%s2459_s2 + $0x8] sm:$0xff] %v1698_v36   ;;  %v1693_v39 = vpack.c.bf16 %v512_v37, %v509_v34  ;;  %v1279_v40 = vadd.f32 %v512_v37, %v509_v34  ;;  %v1349_v41 = vmul.f32 %v512_v37, %v512_v37  ;;  %v2186_v9 = vpop.f32.mrf.mxu1 }
  0xce   :  { %v1922_v42 = vpop.f32.mrf.mxu0  ;;  %1866 = vst [vmem:[%s2459_s2 + $0x88] sm:$0xff] %v1778_v7   ;;  %v1773_v15 = vpack.c.bf16 %v2186_v9, %v2177_v62 }
  0xcf   :  { %1694 = vst [vmem:[%s2459_s2] sm:$0xff] %v1693_v39   ;;  %v1280_v44 = vadd.f32 %v1918_v33, %v1279_v40  ;;  %v1412_v45 = vadd.f32 %v1349_v41, %v1348_v38  ;;  %v1354_v63 = vmul.f32 %v1922_v42, %v1922_v42  ;;  %v2193_v16 = vpop.f32.mrf.mxu1 }
  0xd0   :  { %v525_v46 = vpop.f32.mrf.mxu0  ;;  %1865 = vst [vmem:[%s2459_s2 + $0x80] sm:$0xff] %v1773_v15  }
  0xd1   :  { %v1413_v48 = vadd.f32 %v1412_v45, %v1350_v43  ;;  %v1281_v49 = vadd.f32 %v1919_v35, %v1280_v44  ;;  %v1352_v52 = vmul.f32 %v525_v46, %v525_v46  ;;  %v2201_v22 = vpop.f32.mrf.mxu1 }
  0xd2   :  { %v1923_v50 = vpop.f32.mrf.mxu0 }
  0xd3   :  { %v1282_v51 = vadd.f32 %v1281_v49, %v525_v46  ;;  %v1414_v53 = vadd.f32 %v1413_v48, %v1351_v47  ;;  %v1708_v54 = vpack.c.bf16 %v1923_v50, %v1922_v42  ;;  %v1355_v4 = vmul.f32 %v1923_v50, %v1923_v50  ;;  %v2206_v27 = vpop.f32.mrf.mxu1 }
  0xd4   :  { %v528_v55 = vpop.f32.mrf.mxu0  ;;  %v1788_v31 = vpack.c.bf16 %v2206_v27, %v2193_v16 }
  0xd5   :  { %v1415_v57 = vadd.f32 %v1414_v53, %v1352_v52  ;;  %1852 = vst [vmem:[%s2459_s2 + $0x18] sm:$0xff] %v1708_v54   ;;  %v1703_v58 = vpack.c.bf16 %v528_v55, %v525_v46  ;;  %v1283_v59 = vadd.f32 %v1282_v51, %v528_v55  ;;  %v1353_v60 = vmul.f32 %v528_v55, %v528_v55  ;;  %v2210_v33 = vpop.f32.mrf.mxu1 }
  0xd6   :  { %v1926_v61 = vpop.f32.mrf.mxu0  ;;  %1868 = vst [vmem:[%s2459_s2 + $0x98] sm:$0xff] %v1788_v31   ;;  %v1783_v39 = vpack.c.bf16 %v2210_v33, %v2201_v22 }
  0xd7   :  { %1851 = vst [vmem:[%s2459_s2 + $0x10] sm:$0xff] %v1703_v58   ;;  %v1284_v0 = vadd.f32 %v1922_v42, %v1283_v59  ;;  %v1416_v1 = vadd.f32 %v1415_v57, %v1353_v60  ;;  %v1358_v23 = vmul.f32 %v1926_v61, %v1926_v61  ;;  %v2217_v40 = vpop.f32.mrf.mxu1 }
  0xd8   :  { %v541_v2 = vpop.f32.mrf.mxu0  ;;  %1867 = vst [vmem:[%s2459_s2 + $0x90] sm:$0xff] %v1783_v39  }
  0xd9   :  { %v1417_v5 = vadd.f32 %v1416_v1, %v1354_v63  ;;  %v1285_v6 = vadd.f32 %v1923_v50, %v1284_v0  ;;  %v1356_v11 = vmul.f32 %v541_v2, %v541_v2  ;;  %v2225_v46 = vpop.f32.mrf.mxu1 }
  0xda   :  { %v1927_v8 = vpop.f32.mrf.mxu0 }
  0xdb   :  { %v1286_v10 = vadd.f32 %v1285_v6, %v541_v2  ;;  %v1418_v12 = vadd.f32 %v1417_v5, %v1355_v4  ;;  %v1718_v13 = vpack.c.bf16 %v1927_v8, %v1926_v61  ;;  %v1359_v28 = vmul.f32 %v1927_v8, %v1927_v8  ;;  %v2230_v51 = vpop.f32.mrf.mxu1 }
  0xdc   :  { %v544_v14 = vpop.f32.mrf.mxu0  ;;  %v1798_v55 = vpack.c.bf16 %v2230_v51, %v2217_v40 }
  0xdd   :  { %v1419_v17 = vadd.f32 %v1418_v12, %v1356_v11  ;;  %1854 = vst [vmem:[%s2459_s2 + $0x28] sm:$0xff] %v1718_v13   ;;  %v1713_v18 = vpack.c.bf16 %v544_v14, %v541_v2  ;;  %v1287_v19 = vadd.f32 %v1286_v10, %v544_v14  ;;  %v1357_v20 = vmul.f32 %v544_v14, %v544_v14  ;;  %v2234_v58 = vpop.f32.mrf.mxu1 }
  0xde   :  { %v1930_v21 = vpop.f32.mrf.mxu0  ;;  %1870 = vst [vmem:[%s2459_s2 + $0xa8] sm:$0xff] %v1798_v55   ;;  %v1793_v1 = vpack.c.bf16 %v2234_v58, %v2225_v46 }
  0xdf   :  { %1853 = vst [vmem:[%s2459_s2 + $0x20] sm:$0xff] %v1713_v18   ;;  %v1288_v24 = vadd.f32 %v1926_v61, %v1287_v19  ;;  %v1420_v25 = vadd.f32 %v1419_v17, %v1357_v20  ;;  %v1362_v47 = vmul.f32 %v1930_v21, %v1930_v21  ;;  %v2241_v2 = vpop.f32.mrf.mxu1 }
  0xe0   :  { %v557_v26 = vpop.f32.mrf.mxu0  ;;  %1869 = vst [vmem:[%s2459_s2 + $0xa0] sm:$0xff] %v1793_v1  }
  0xe1   :  { %v1421_v29 = vadd.f32 %v1420_v25, %v1358_v23  ;;  %v1289_v30 = vadd.f32 %v1927_v8, %v1288_v24  ;;  %v1360_v35 = vmul.f32 %v557_v26, %v557_v26  ;;  %v2249_v10 = vpop.f32.mrf.mxu1 }
  0xe2   :  { %v1931_v32 = vpop.f32.mrf.mxu0 }
  0xe3   :  { %v1290_v34 = vadd.f32 %v1289_v30, %v557_v26  ;;  %v1422_v36 = vadd.f32 %v1421_v29, %v1359_v28  ;;  %v1728_v37 = vpack.c.bf16 %v1931_v32, %v1930_v21  ;;  %v1363_v52 = vmul.f32 %v1931_v32, %v1931_v32  ;;  %v2254_v15 = vpop.f32.mrf.mxu1 }
  0xe4   :  { %v560_v38 = vpop.f32.mrf.mxu0  ;;  %v1808_v20 = vpack.c.bf16 %v2254_v15, %v2241_v2 }
  0xe5   :  { %v1423_v41 = vadd.f32 %v1422_v36, %v1360_v35  ;;  %1856 = vst [vmem:[%s2459_s2 + $0x38] sm:$0xff] %v1728_v37   ;;  %v1723_v42 = vpack.c.bf16 %v560_v38, %v557_v26  ;;  %v1291_v43 = vadd.f32 %v1290_v34, %v560_v38  ;;  %v1361_v44 = vmul.f32 %v560_v38, %v560_v38  ;;  %v2258_v23 = vpop.f32.mrf.mxu1 }
  0xe6   :  { %v1934_v45 = vpop.f32.mrf.mxu0  ;;  %1872 = vst [vmem:[%s2459_s2 + $0xb8] sm:$0xff] %v1808_v20   ;;  %v1803_v30 = vpack.c.bf16 %v2258_v23, %v2249_v10 }
  0xe7   :  { %1855 = vst [vmem:[%s2459_s2 + $0x30] sm:$0xff] %v1723_v42   ;;  %v1292_v48 = vadd.f32 %v1930_v21, %v1291_v43  ;;  %v1424_v49 = vadd.f32 %v1423_v41, %v1361_v44  ;;  %v1366_v11 = vmul.f32 %v1934_v45, %v1934_v45  ;;  %v2265_v31 = vpop.f32.mrf.mxu1 }
  0xe8   :  { %v573_v50 = vpop.f32.mrf.mxu0  ;;  %1871 = vst [vmem:[%s2459_s2 + $0xb0] sm:$0xff] %v1803_v30  }
  0xe9   :  { %v1425_v53 = vadd.f32 %v1424_v49, %v1362_v47  ;;  %v1293_v54 = vadd.f32 %v1931_v32, %v1292_v48  ;;  %v1364_v60 = vmul.f32 %v573_v50, %v573_v50  ;;  %v2273_v38 = vpop.f32.mrf.mxu1 }
  0xea   :  { %v1935_v57 = vpop.f32.mrf.mxu0 }
  0xeb   :  { %v1294_v59 = vadd.f32 %v1293_v54, %v573_v50  ;;  %v1426_v61 = vadd.f32 %v1425_v53, %v1363_v52  ;;  %v1738_v63 = vpack.c.bf16 %v1935_v57, %v1934_v45  ;;  %v1367_v17 = vmul.f32 %v1935_v57, %v1935_v57  ;;  %v2278_v44 = vpop.f32.mrf.mxu1 }
  0xec   :  { %v576_v0 = vpop.f32.mrf.mxu0  ;;  %v1818_v49 = vpack.c.bf16 %v2278_v44, %v2265_v31 }
  0xed   :  { %v1427_v4 = vadd.f32 %v1426_v61, %v1364_v60  ;;  %1858 = vst [vmem:[%s2459_s2 + $0x48] sm:$0xff] %v1738_v63   ;;  %v1733_v5 = vpack.c.bf16 %v576_v0, %v573_v50  ;;  %v1295_v6 = vadd.f32 %v1294_v59, %v576_v0  ;;  %v1365_v7 = vmul.f32 %v576_v0, %v576_v0  ;;  %v2282_v52 = vpop.f32.mrf.mxu1 }
  0xee   :  { %v1938_v8 = vpop.f32.mrf.mxu0  ;;  %1874 = vst [vmem:[%s2459_s2 + $0xc8] sm:$0xff] %v1818_v49   ;;  %v1813_v60 = vpack.c.bf16 %v2282_v52, %v2273_v38 }
  0xef   :  { %1857 = vst [vmem:[%s2459_s2 + $0x40] sm:$0xff] %v1733_v5   ;;  %v1296_v12 = vadd.f32 %v1934_v45, %v1295_v6  ;;  %v1428_v13 = vadd.f32 %v1427_v4, %v1365_v7  ;;  %v1370_v39 = vmul.f32 %v1938_v8, %v1938_v8  ;;  %v2289_v61 = vpop.f32.mrf.mxu1 }
  0xf0   :  { %v589_v14 = vpop.f32.mrf.mxu0  ;;  %1873 = vst [vmem:[%s2459_s2 + $0xc0] sm:$0xff] %v1813_v60  }
  0xf1   :  { %v1429_v18 = vadd.f32 %v1428_v13, %v1366_v11  ;;  %v1297_v19 = vadd.f32 %v1935_v57, %v1296_v12  ;;  %v1368_v25 = vmul.f32 %v589_v14, %v589_v14  ;;  %v2297_v6 = vpop.f32.mrf.mxu1 }
  0xf2   :  { %v1939_v21 = vpop.f32.mrf.mxu0 }
  0xf3   :  { %v1298_v24 = vadd.f32 %v1297_v19, %v589_v14  ;;  %v1430_v26 = vadd.f32 %v1429_v18, %v1367_v17  ;;  %v1748_v28 = vpack.c.bf16 %v1939_v21, %v1938_v8  ;;  %v1371_v45 = vmul.f32 %v1939_v21, %v1939_v21  ;;  %v2302_v13 = vpop.f32.mrf.mxu1 }
  0xf4   :  { %v592_v29 = vpop.f32.mrf.mxu0  ;;  %v1828_v19 = vpack.c.bf16 %v2302_v13, %v2289_v61 }
  0xf5   :  { %v1431_v32 = vadd.f32 %v1430_v26, %v1368_v25  ;;  %1860 = vst [vmem:[%s2459_s2 + $0x58] sm:$0xff] %v1748_v28   ;;  %v1743_v34 = vpack.c.bf16 %v592_v29, %v589_v14  ;;  %v1299_v35 = vadd.f32 %v1298_v24, %v592_v29  ;;  %v1369_v36 = vmul.f32 %v592_v29, %v592_v29 }
  0xf6   :  { %v1942_v37 = vpop.f32.mrf.mxu0  ;;  %1876 = vst [vmem:[%s2459_s2 + $0xd8] sm:$0xff] %v1828_v19   ;;  %v1384_v19 = vmul.f32 %v2201_v22, %v2201_v22 }
  0xf7   :  { %1859 = vst [vmem:[%s2459_s2 + $0x50] sm:$0xff] %v1743_v34   ;;  %v1300_v41 = vadd.f32 %v1938_v8, %v1299_v35  ;;  %v1432_v42 = vadd.f32 %v1431_v32, %v1369_v36  ;;  %v1374_v7 = vmul.f32 %v1942_v37, %v1942_v37 }
  0xf8   :  { %v605_v43 = vpop.f32.mrf.mxu0 }
  0xf9   :  { %v1433_v47 = vadd.f32 %v1432_v42, %v1370_v39  ;;  %v1301_v48 = vadd.f32 %v1939_v21, %v1300_v41  ;;  %v1372_v54 = vmul.f32 %v605_v43, %v605_v43  ;;  %v2306_v21 = vpop.f32.mrf.mxu1 }
  0xfa   :  { %v1943_v50 = vpop.f32.mrf.mxu0  ;;  %v1823_v30 = vpack.c.bf16 %v2306_v21, %v2297_v6 }
  0xfb   :  { %v1302_v53 = vadd.f32 %v1301_v48, %v605_v43  ;;  %v1434_v55 = vadd.f32 %v1433_v47, %v1371_v45  ;;  %v1758_v57 = vpack.c.bf16 %v1943_v50, %v1942_v37  ;;  %v1375_v14 = vmul.f32 %v1943_v50, %v1943_v50  ;;  %v2313_v32 = vpop.f32.mrf.mxu1 }
  0xfc   :  { %v608_v59 = vpop.f32.mrf.mxu0  ;;  %1875 = vst [vmem:[%s2459_s2 + $0xd0] sm:$0xff] %v1823_v30  }
  0xfd   :  { %v1435_v63 = vadd.f32 %v1434_v55, %v1372_v54  ;;  %1862 = vst [vmem:[%s2459_s2 + $0x68] sm:$0xff] %v1758_v57   ;;  %v1753_v0 = vpack.c.bf16 %v608_v59, %v605_v43  ;;  %v1303_v1 = vadd.f32 %v1302_v53, %v608_v59  ;;  %v1373_v4 = vmul.f32 %v608_v59, %v608_v59  ;;  %v2321_v39 = vpop.f32.mrf.mxu1 }
  0xfe   :  { %v1946_v5 = vpop.f32.mrf.mxu0  ;;  %v1380_v54 = vmul.f32 %v2177_v62, %v2177_v62 }
  0xff   :  { %1861 = vst [vmem:[%s2459_s2 + $0x60] sm:$0xff] %v1753_v0   ;;  %v1304_v8 = vadd.f32 %v1942_v37, %v1303_v1  ;;  %v1436_v11 = vadd.f32 %v1435_v63, %v1373_v4  ;;  %v1378_v41 = vmul.f32 %v1946_v5, %v1946_v5  ;;  %v2326_v45 = vpop.f32.mrf.mxu1  ;;  %v1381_v0 = vmul.f32 %v2186_v9, %v2186_v9 }
 0x100   :  { %v621_v12 = vpop.f32.mrf.mxu0  ;;  %v1382_v4 = vmul.f32 %v2172_v56, %v2172_v56 }
 0x101   :  { %v1437_v17 = vadd.f32 %v1436_v11, %v1374_v7  ;;  %v1305_v18 = vadd.f32 %v1943_v50, %v1304_v8  ;;  %v1376_v25 = vmul.f32 %v621_v12, %v621_v12  ;;  %v1838_v50 = vpack.c.bf16 %v2326_v45, %v2313_v32  ;;  %v2330_v53 = vpop.f32.mrf.mxu1 }
 0x102   :  { %v1947_v20 = vpop.f32.mrf.mxu0  ;;  %v1833_v59 = vpack.c.bf16 %v2330_v53, %v2321_v39  ;;  %v1383_v11 = vmul.f32 %v2182_v3, %v2182_v3 }
 0x103   :  { %v1306_v24 = vadd.f32 %v1305_v18, %v621_v12  ;;  %v1438_v26 = vadd.f32 %v1437_v17, %v1375_v14  ;;  %v1768_v28 = vpack.c.bf16 %v1947_v20, %v1946_v5  ;;  %v1379_v47 = vmul.f32 %v1947_v20, %v1947_v20  ;;  %1878 = vst [vmem:[%s2459_s2 + $0xe8] sm:$0xff] %v1838_v50   ;;  %v2340_v60 = vpop.f32.mrf.mxu1 }
 0x104   :  { %v624_v29 = vpop.f32.mrf.mxu0  ;;  %1877 = vst [vmem:[%s2459_s2 + $0xe0] sm:$0xff] %v1833_v59   ;;  %v1392_v50 = vmul.f32 %v2249_v10, %v2249_v10 }
 0x105   :  { %v1439_v34 = vadd.f32 %v1438_v26, %v1376_v25  ;;  %1864 = vst [vmem:[%s2459_s2 + $0x78] sm:$0xff] %v1768_v28   ;;  %v1763_v35 = vpack.c.bf16 %v624_v29, %v621_v12  ;;  %v1307_v36 = vadd.f32 %v1306_v24, %v624_v29  ;;  %v1377_v37 = vmul.f32 %v624_v29, %v624_v29 }
 0x106   :  { %v1385_v25 = vmul.f32 %v2210_v33, %v2210_v33  ;;  %v1387_v29 = vmul.f32 %v2206_v27, %v2206_v27 }
 0x107   :  { %1863 = vst [vmem:[%s2459_s2 + $0x70] sm:$0xff] %v1763_v35   ;;  %v1308_v42 = vadd.f32 %v1946_v5, %v1307_v36  ;;  %v1440_v43 = vadd.f32 %v1439_v34, %v1377_v37 }
 0x109   :  { %v1309_v48 = vadd.f32 %v1947_v20, %v1308_v42  ;;  %v1441_v49 = vadd.f32 %v1440_v43, %v1378_v41  ;;  %v1389_v42 = vmul.f32 %v2234_v58, %v2234_v58 }
 0x10b   :  { %v1442_v55 = vadd.f32 %v1441_v49, %v1379_v47  ;;  %v1310_v57 = vadd.f32 %v1309_v48, %v2177_v62  ;;  %v2348_v62 = vpop.f32.mrf.mxu1 }
 0x10d   :  { %v1311_v63 = vadd.f32 %v1310_v57, %v2186_v9  ;;  %v1443_v1 = vadd.f32 %v1442_v55, %v1380_v54  ;;  %v2353_v8 = vpop.f32.mrf.mxu1  ;;  %v1393_v57 = vmul.f32 %v2258_v23, %v2258_v23 }
 0x10e   :  { %v1848_v14 = vpack.c.bf16 %v2353_v8, %v2340_v60 }
 0x10f   :  { %v1312_v5 = vadd.f32 %v2172_v56, %v1311_v63  ;;  %v1444_v7 = vadd.f32 %v1443_v1, %v1381_v0  ;;  %v2360_v17 = vpop.f32.mrf.mxu1 }
 0x110   :  { %1880 = vst [vmem:[%s2459_s2 + $0xf8] sm:$0xff] %v1848_v14   ;;  %v1843_v20 = vpack.c.bf16 %v2360_v17, %v2348_v62 }
 0x111   :  { %v1445_v12 = vadd.f32 %v1444_v7, %v1382_v4  ;;  %v1313_v9 = vadd.f32 %v2182_v3, %v1312_v5  ;;  %v1396_v4 = vmul.f32 %v2273_v38, %v2273_v38 }
 0x112   :  { %1879 = vst [vmem:[%s2459_s2 + $0xf0] sm:$0xff] %v1843_v20  }
 0x113   :  { %v1314_v18 = vadd.f32 %v1313_v9, %v2201_v22  ;;  %v1446_v56 = vadd.f32 %v1445_v12, %v1383_v11  ;;  %v1386_v22 = vmul.f32 %v2193_v16, %v2193_v16  ;;  %v1397_v11 = vmul.f32 %v2282_v52, %v2282_v52 }
 0x115   :  { %v1447_v24 = vadd.f32 %v1446_v56, %v1384_v19  ;;  %v1315_v3 = vadd.f32 %v1314_v18, %v2210_v33  ;;  %v1388_v33 = vmul.f32 %v2225_v46, %v2225_v46  ;;  %v1400_v19 = vmul.f32 %v2297_v6, %v2297_v6 }
 0x117   :  { %v1316_v26 = vadd.f32 %v2193_v16, %v1315_v3  ;;  %v1448_v28 = vadd.f32 %v1447_v24, %v1385_v25  ;;  %v1390_v16 = vmul.f32 %v2217_v40, %v2217_v40  ;;  %v1401_v24 = vmul.f32 %v2306_v21, %v2306_v21 }
 0x119   :  { %v1449_v30 = vadd.f32 %v1448_v28, %v1386_v22  ;;  %v1317_v34 = vadd.f32 %v2206_v27, %v1316_v26  ;;  %v1391_v27 = vmul.f32 %v2230_v51, %v2230_v51  ;;  %v1404_v28 = vmul.f32 %v2321_v39, %v2321_v39 }
 0x11b   :  { %v1318_v35 = vadd.f32 %v1317_v34, %v2225_v46  ;;  %v1450_v36 = vadd.f32 %v1449_v30, %v1387_v29  ;;  %v1405_v34 = vmul.f32 %v2330_v53, %v2330_v53 }
 0x11d   :  { %v1451_v37 = vadd.f32 %v1450_v36, %v1388_v33  ;;  %v1319_v41 = vadd.f32 %v1318_v35, %v2234_v58 }
 0x11f   :  { %v1320_v43 = vadd.f32 %v2217_v40, %v1319_v41  ;;  %v1452_v47 = vadd.f32 %v1451_v37, %v1389_v42  ;;  %v1394_v40 = vmul.f32 %v2241_v2, %v2241_v2  ;;  %v1408_v41 = vmul.f32 %v2348_v62, %v2348_v62 }
 0x121   :  { %v1453_v48 = vadd.f32 %v1452_v47, %v1390_v16  ;;  %v1321_v49 = vadd.f32 %v2230_v51, %v1320_v43  ;;  %v1395_v51 = vmul.f32 %v2254_v15, %v2254_v15  ;;  %v1409_v43 = vmul.f32 %v2360_v17, %v2360_v17 }
 0x123   :  { %v1322_v46 = vadd.f32 %v1321_v49, %v2249_v10  ;;  %v1454_v54 = vadd.f32 %v1453_v48, %v1391_v27 }
 0x125   :  { %v1455_v55 = vadd.f32 %v1454_v54, %v1392_v50  ;;  %v1323_v58 = vadd.f32 %v1322_v46, %v2258_v23 }
 0x127   :  { %v1324_v59 = vadd.f32 %v2241_v2, %v1323_v58  ;;  %v1456_v63 = vadd.f32 %v1455_v55, %v1393_v57  ;;  %v1398_v2 = vmul.f32 %v2265_v31, %v2265_v31  ;;  %v1481_v55 = vlaneseq }
 0x129   :  { %v1457_v0 = vadd.f32 %v1456_v63, %v1394_v40  ;;  %v1325_v1 = vadd.f32 %v2254_v15, %v1324_v59  ;;  %v1399_v15 = vmul.f32 %v2278_v44, %v2278_v44  ;;  %v1482_v59 = vshrl.u32 %v1481_v55, 7 }
 0x12b   :  { %v1326_v10 = vadd.f32 %v1325_v1, %v2273_v38  ;;  %v1458_v5 = vadd.f32 %v1457_v0, %v1395_v51  ;;  %vm1483_vm1 = vcmp.eq.s32.totalorder %v1482_v59, 0  ;;  %vm1485_vm2 = vcmp.eq.s32.totalorder %v1482_v59, 1 }
 0x12d   :  { %v1459_v7 = vadd.f32 %v1458_v5, %v1396_v4  ;;  %v1327_v23 = vadd.f32 %v1326_v10, %v2282_v52 }
 0x12f   :  { %v1328_v12 = vadd.f32 %v2265_v31, %v1327_v23  ;;  %v1460_v9 = vadd.f32 %v1459_v7, %v1397_v11  ;;  %v1402_v31 = vmul.f32 %v2289_v61, %v2289_v61 }
 0x131   :  { %v1461_v14 = vadd.f32 %v1460_v9, %v1398_v2  ;;  %v1329_v18 = vadd.f32 %v2278_v44, %v1328_v12  ;;  %v1403_v44 = vmul.f32 %v2302_v13, %v2302_v13 }
 0x133   :  { %v1330_v38 = vadd.f32 %v1329_v18, %v2297_v6  ;;  %v1462_v56 = vadd.f32 %v1461_v14, %v1399_v15 }
 0x135   :  { %v1463_v20 = vadd.f32 %v1462_v56, %v1400_v19  ;;  %v1331_v52 = vadd.f32 %v1330_v38, %v2306_v21 }
 0x137   :  { %v1332_v3 = vadd.f32 %v2289_v61, %v1331_v52  ;;  %v1464_v25 = vadd.f32 %v1463_v20, %v1401_v24  ;;  %v1406_v61 = vmul.f32 %v2313_v32, %v2313_v32 }
 0x139   :  { %v1465_v22 = vadd.f32 %v1464_v25, %v1402_v31  ;;  %v1333_v26 = vadd.f32 %v2302_v13, %v1332_v3  ;;  %v1407_v13 = vmul.f32 %v2326_v45, %v2326_v45 }
 0x13b   :  { %v1334_v6 = vadd.f32 %v1333_v26, %v2321_v39  ;;  %v1466_v29 = vadd.f32 %v1465_v22, %v1403_v44 }
 0x13d   :  { %v1467_v30 = vadd.f32 %v1466_v29, %v1404_v28  ;;  %v1335_v21 = vadd.f32 %v1334_v6, %v2330_v53 }
 0x13f   :  { %v1336_v35 = vadd.f32 %v2313_v32, %v1335_v21  ;;  %v1468_v33 = vadd.f32 %v1467_v30, %v1405_v34  ;;  %v1410_v32 = vmul.f32 %v2340_v60, %v2340_v60 }
 0x141   :  { %v1469_v36 = vadd.f32 %v1468_v33, %v1406_v61  ;;  %v1337_v37 = vadd.f32 %v2326_v45, %v1336_v35  ;;  %v1411_v45 = vmul.f32 %v2353_v8, %v2353_v8 }
 0x143   :  { %v1338_v39 = vadd.f32 %v1337_v37, %v2348_v62  ;;  %v1470_v42 = vadd.f32 %v1469_v36, %v1407_v13 }
 0x145   :  { %v1471_v16 = vadd.f32 %v1470_v42, %v1408_v41  ;;  %v1339_v53 = vadd.f32 %v1338_v39, %v2360_v17 }
 0x147   :  { %v1340_v47 = vadd.f32 %v2340_v60, %v1339_v53  ;;  %v1472_v27 = vadd.f32 %v1471_v16, %v1409_v43 }
 0x149   :  { %v1341_v48 = vadd.f32 %v2353_v8, %v1340_v47  ;;  %v1473_v49 = vadd.f32 %v1472_v27, %v1410_v32 }
 0x14b   :  { %v1342_v62 = vrot.slane %v1341_v48, 4  ;;  %v1474_v46 = vadd.f32 %v1473_v49, %v1411_v45 }
 0x14d   :  { %v1343_v50 = vadd.f32 %v1342_v62, %v1341_v48  ;;  %v1475_v54 = vrot.slane %v1474_v46, 4 }
 0x14f   :  { %v1344_v58 = vrot.slane %v1343_v50, 2  ;;  %v1476_v57 = vadd.f32 %v1475_v54, %v1474_v46 }
 0x151   :  { %v1345_v17 = vadd.f32 %v1344_v58, %v1343_v50  ;;  %v1477_v40 = vrot.slane %v1476_v57, 2 }
 0x153   :  { %v1346_v63 = vrot.slane %v1345_v17, 1  ;;  %v1478_v51 = vadd.f32 %v1477_v40, %v1476_v57 }
 0x155   :  { %v1347_v60 = vadd.f32 %v1346_v63, %v1345_v17  ;;  %v1479_v0 = vrot.slane %v1478_v51, 1 }
 0x157   :  { %v1480_v1 = vadd.f32 %v1479_v0, %v1478_v51  ;;  %v1484_v10 = vsel %vm1483_vm1, %v1347_v60, 0.0 }
 0x159   :  { %v1486_v8 = vsel %vm1485_vm2, %v1480_v1, 0.0 }
 0x15a   :  { %v1487_v4 = vadd.f32 %v1486_v8, %v1484_v10 }
 0x15c   :  { %1488 = vst [vmem:[%s2460_s3] sm:$0xff] %v1487_v4 }

// kernel: resnet_bottleneck_forward.13
= control target key start
LH: loop header
LB: loop body
LE: loop exit
PB: predicated region body
PF: predicated region fallthrough
CT: control target
= control target key end

     0   :  { %s422_s0 = inlined_call_operand.vmem [shape: bf16[128,128], index: 0, kind: input, shape index: {}]   ;;  %s423_s1 = inlined_call_operand.vmem [shape: f32[1,128], index: 1, kind: input, shape index: {}]   ;;  %s424_s2 = inlined_call_operand.vmem [shape: f32[1,128], index: 2, kind: input, shape index: {}]   ;;  %s425_s3 = inlined_call_operand.vmem [shape: bf16[128,128], index: 3, kind: output, shape index: {}]  }
   0x1   :  { %v227_v0 = vld [vmem:[%s422_s0] sm:$0xff]   ;;  %v298_v4 = vld [vmem:[%s422_s0 + $0x8] sm:$0xff]   ;;  %v299_v5 = vld [vmem:[%s422_s0 + $0x10] sm:$0xff]  }
   0x2   :  { %v338_v1 = vld [vmem:[%s423_s1] ss:$0 sm:$0xff]  ;;  %v228_v2 = vunpack.c.l.bf16 %v227_v0  ;;  %v229_v3 = vunpack.c.h.bf16 %v227_v0  ;;  %v300_v6 = vld [vmem:[%s422_s0 + $0x18] sm:$0xff]   ;;  %v232_v8 = vunpack.c.l.bf16 %v298_v4  ;;  %v233_v9 = vunpack.c.h.bf16 %v298_v4  ;;  %v302_v33 = vld [vmem:[%s422_s0 + $0x28] sm:$0xff]  }
   0x3   :  { %v352_v7 = vld [vmem:[%s424_s2] ss:$0 sm:$0xff]  ;;  %v236_v10 = vunpack.c.l.bf16 %v299_v5  ;;  %v237_v11 = vunpack.c.h.bf16 %v299_v5  ;;  %v240_v14 = vunpack.c.l.bf16 %v300_v6  ;;  %v241_v15 = vunpack.c.h.bf16 %v300_v6  ;;  %v303_v38 = vld [vmem:[%s422_s0 + $0x30] sm:$0xff]   ;;  %v304_v43 = vld [vmem:[%s422_s0 + $0x38] sm:$0xff]  }
   0x4   :  { %v53_v12 = vmul.f32 %v228_v2, %v338_v1  ;;  %v54_v13 = vmul.f32 %v229_v3, %v338_v1  ;;  %v55_v16 = vmul.f32 %v232_v8, %v338_v1  ;;  %v56_v17 = vmul.f32 %v233_v9, %v338_v1  ;;  %v301_v28 = vld [vmem:[%s422_s0 + $0x20] sm:$0xff]  }
   0x5   :  { %v57_v18 = vmul.f32 %v236_v10, %v338_v1  ;;  %v58_v19 = vmul.f32 %v237_v11, %v338_v1  ;;  %v59_v22 = vmul.f32 %v240_v14, %v338_v1  ;;  %v60_v23 = vmul.f32 %v241_v15, %v338_v1 }
   0x6   :  { %v76_v20 = vadd.f32 %v352_v7, %v53_v12  ;;  %v77_v21 = vadd.f32 %v352_v7, %v54_v13  ;;  %v78_v24 = vadd.f32 %v352_v7, %v55_v16  ;;  %v79_v25 = vadd.f32 %v352_v7, %v56_v17 }
   0x7   :  { %v80_v26 = vadd.f32 %v352_v7, %v57_v18  ;;  %v81_v27 = vadd.f32 %v352_v7, %v58_v19  ;;  %v82_v31 = vadd.f32 %v352_v7, %v59_v22  ;;  %v83_v32 = vadd.f32 %v352_v7, %v60_v23 }
   0x8   :  { %v92_v29 = vmax.f32 %v76_v20, 0.0  ;;  %v93_v30 = vmax.f32 %v77_v21, 0.0  ;;  %v94_v34 = vmax.f32 %v78_v24, 0.0  ;;  %v95_v35 = vmax.f32 %v79_v25, 0.0 }
   0x9   :  { %v96_v36 = vmax.f32 %v80_v26, 0.0  ;;  %v97_v37 = vmax.f32 %v81_v27, 0.0  ;;  %v98_v40 = vmax.f32 %v82_v31, 0.0  ;;  %v99_v41 = vmax.f32 %v83_v32, 0.0 }
   0xa   :  { %v261_v39 = vpack.c.bf16 %v93_v30, %v92_v29  ;;  %v244_v42 = vunpack.c.l.bf16 %v301_v28  ;;  %v266_v44 = vpack.c.bf16 %v95_v35, %v94_v34  ;;  %v245_v46 = vunpack.c.h.bf16 %v301_v28 }
   0xb   :  { %v271_v45 = vpack.c.bf16 %v97_v37, %v96_v36  ;;  %v248_v47 = vunpack.c.l.bf16 %v302_v33  ;;  %v276_v48 = vpack.c.bf16 %v99_v41, %v98_v40  ;;  %v249_v50 = vunpack.c.h.bf16 %v302_v33 }
   0xc   :  { %262 = vst [vmem:[%s425_s3] sm:$0xff] %v261_v39   ;;  %v61_v49 = vmul.f32 %v244_v42, %v338_v1  ;;  %v252_v51 = vunpack.c.l.bf16 %v303_v38  ;;  %305 = vst [vmem:[%s425_s3 + $0x8] sm:$0xff] %v266_v44   ;;  %v62_v52 = vmul.f32 %v245_v46, %v338_v1  ;;  %v253_v54 = vunpack.c.h.bf16 %v303_v38 }
   0xd   :  { %306 = vst [vmem:[%s425_s3 + $0x10] sm:$0xff] %v271_v45   ;;  %v63_v53 = vmul.f32 %v248_v47, %v338_v1  ;;  %v256_v55 = vunpack.c.l.bf16 %v304_v43  ;;  %307 = vst [vmem:[%s425_s3 + $0x18] sm:$0xff] %v276_v48   ;;  %v64_v57 = vmul.f32 %v249_v50, %v338_v1  ;;  %v257_v59 = vunpack.c.h.bf16 %v304_v43 }
   0xe   :  { %v84_v56 = vadd.f32 %v352_v7, %v61_v49  ;;  %v65_v58 = vmul.f32 %v252_v51, %v338_v1  ;;  %v85_v60 = vadd.f32 %v352_v7, %v62_v52  ;;  %v66_v62 = vmul.f32 %v253_v54, %v338_v1 }
   0xf   :  { %v86_v61 = vadd.f32 %v352_v7, %v63_v53  ;;  %v67_v63 = vmul.f32 %v256_v55, %v338_v1  ;;  %v87_v2 = vadd.f32 %v352_v7, %v64_v57  ;;  %v68_v4 = vmul.f32 %v257_v59, %v338_v1 }
  0x10   :  { %v100_v0 = vmax.f32 %v84_v56, 0.0  ;;  %v88_v3 = vadd.f32 %v352_v7, %v65_v58  ;;  %v101_v5 = vmax.f32 %v85_v60, 0.0  ;;  %v89_v8 = vadd.f32 %v352_v7, %v66_v62 }
  0x11   :  { %v102_v6 = vmax.f32 %v86_v61, 0.0  ;;  %v90_v9 = vadd.f32 %v352_v7, %v67_v63  ;;  %v103_v10 = vmax.f32 %v87_v2, 0.0  ;;  %v91_v12 = vadd.f32 %v352_v7, %v68_v4 }
  0x12   :  { %v104_v11 = vmax.f32 %v88_v3, 0.0  ;;  %v281_v13 = vpack.c.bf16 %v101_v5, %v100_v0  ;;  %v105_v14 = vmax.f32 %v89_v8, 0.0 }
  0x13   :  { %v106_v15 = vmax.f32 %v90_v9, 0.0  ;;  %v286_v16 = vpack.c.bf16 %v103_v10, %v102_v6  ;;  %v107_v17 = vmax.f32 %v91_v12, 0.0 }
  0x14   :  { %308 = vst [vmem:[%s425_s3 + $0x20] sm:$0xff] %v281_v13   ;;  %v291_v1 = vpack.c.bf16 %v105_v14, %v104_v11 }
  0x15   :  { %309 = vst [vmem:[%s425_s3 + $0x28] sm:$0xff] %v286_v16   ;;  %v296_v18 = vpack.c.bf16 %v107_v17, %v106_v15 }
  0x16   :  { %310 = vst [vmem:[%s425_s3 + $0x30] sm:$0xff] %v291_v1  }
  0x17   :  { %311 = vst [vmem:[%s425_s3 + $0x38] sm:$0xff] %v296_v18  }

// kernel: resnet_bottleneck_forward.12
= control target key start
LH: loop header
LB: loop body
LE: loop exit
PB: predicated region body
PF: predicated region fallthrough
CT: control target
= control target key end

     0   :  { %vm130_vm0 = vcmask 392192   ;;  %s693_s1 = inlined_call_operand.vmem [shape: bf16[48,128], index: 1, kind: input, shape index: {}]   ;;  %s694_s0 = inlined_call_operand.vmem [shape: bf16[128,48], index: 0, kind: input, shape index: {}]   ;;  %s695_s2 = inlined_call_operand.vmem [shape: bf16[128,128], index: 2, kind: output, shape index: {0}]   ;;  %s696_s3 = inlined_call_operand.vmem [shape: f32[1,8,128], index: 3, kind: output, shape index: {1}]  }
   0x1   :  { %v594_v0 = vld [vmem:[%s693_s1 + $0x10] sm:$0xff]   ;;  %v595_v1 = vld [vmem:[%s693_s1 + $0x8] sm:$0xff]   ;;  %v597_v2 = vld [vmem:[%s694_s0] sm:$0xff]  }
   0x2   :  { %566 = vmatprep.subr.bf16.mxu0 %v594_v0  ;;  %588 = vmatprep.subr.bf16.mxu1 %v594_v0  ;;  %v596_v3 = vld [vmem:[%s693_s1] sm:$0xff]   ;;  %v598_v5 = vld [vmem:[%s694_s0 + $0x8] sm:$0xff]   ;;  %v599_v7 = vld [vmem:[%s694_s0 + $0x10] sm:$0xff]  }
   0x3   :  { %567 = vmatpush3.bf16.msra.mxu0 %v594_v0  ;;  %591 = vmatpush3.bf16.msra.mxu1 %v594_v0  ;;  %v601_v4 = vld [vmem:[%s694_s0 + $0x20] sm:$0xff]   ;;  %v602_v6 = vld [vmem:[%s694_s0 + $0x28] sm:$0xff]   ;;  %v603_v8 = vld [vmem:[%s694_s0 + $0x30] sm:$0xff]  }
   0x4   :  { %568 = vmatprep.subr.bf16.mxu0 %v595_v1  ;;  %589 = vmatprep.subr.bf16.mxu1 %v595_v1  ;;  %v600_v9 = vld [vmem:[%s694_s0 + $0x18] sm:$0xff]  }
   0x5   :  { %572 = vmatprep.mubr.msk.bf16.mxu0 %vm130_vm0, %v597_v2  ;;  %580 = vmatprep.mubr.msk.bf16.mxu1 %vm130_vm0, %v601_v4  ;;  %v604_v10 = vld [vmem:[%s694_s0 + $0x38] sm:$0xff]  }
   0x7   :  { %569 = vmatpush3.bf16.msra.mxu0 %v595_v1  ;;  %592 = vmatpush3.bf16.msra.mxu1 %v595_v1 }
   0x8   :  { %570 = vmatprep.subr.bf16.mxu0 %v596_v3  ;;  %590 = vmatprep.subr.bf16.mxu1 %v596_v3 }
   0xb   :  { %571 = vmatpush3.bf16.msra.mxu0 %v596_v3  ;;  %593 = vmatpush3.bf16.msra.mxu1 %v596_v3 }
   0xe   :  { %573 = vmatmul.mubr.msk.bf16.vlgmr.msra.gmra.mxu0 %vm130_vm0, %v598_v5  ;;  %581 = vmatmul.mubr.msk.bf16.vlgmr.msra.gmra.mxu1 %vm130_vm0, %v602_v6 }
   0xf   :  { %576 = vmatprep.mubr.msk.bf16.mxu0 %vm130_vm0, %v599_v7  ;;  %584 = vmatprep.mubr.msk.bf16.mxu1 %vm130_vm0, %v603_v8 }
  0x16   :  { %577 = vmatmul.mubr.msk.bf16.gmra.mxu0 %vm130_vm0, %v600_v9  ;;  %585 = vmatmul.mubr.msk.bf16.gmra.mxu1 %vm130_vm0, %v604_v10 }
  0xce   :  { %v574_v11 = vpop.f32.mrf.mxu0  ;;  %v582_v12 = vpop.f32.mrf.mxu1 }
  0xcf   :  { %v406_v28 = vmul.f32 %v574_v11, %v574_v11  ;;  %v414_v62 = vmul.f32 %v582_v12, %v582_v12 }
  0xd0   :  { %v189_v13 = vpop.f32.mrf.mxu0  ;;  %v221_v14 = vpop.f32.mrf.mxu1 }
  0xd1   :  { %v404_v19 = vmul.f32 %v189_v13, %v189_v13  ;;  %v412_v56 = vmul.f32 %v221_v14, %v221_v14 }
  0xd2   :  { %v575_v15 = vpop.f32.mrf.mxu0  ;;  %v583_v16 = vpop.f32.mrf.mxu1 }
  0xd3   :  { %v516_v17 = vpack.c.bf16 %v575_v15, %v574_v11  ;;  %v536_v18 = vpack.c.bf16 %v583_v16, %v582_v12  ;;  %v407_v33 = vmul.f32 %v575_v15, %v575_v15  ;;  %v415_v1 = vmul.f32 %v583_v16, %v583_v16 }
  0xd4   :  { %v192_v20 = vpop.f32.mrf.mxu0  ;;  %v224_v21 = vpop.f32.mrf.mxu1 }
  0xd5   :  { %548 = vst [vmem:[%s695_s2 + $0x8] sm:$0xff] %v516_v17   ;;  %v511_v22 = vpack.c.bf16 %v192_v20, %v189_v13  ;;  %v383_v23 = vadd.f32 %v192_v20, %v189_v13  ;;  %v405_v24 = vmul.f32 %v192_v20, %v192_v20  ;;  %552 = vst [vmem:[%s695_s2 + $0x28] sm:$0xff] %v536_v18  }
  0xd6   :  { %v531_v25 = vpack.c.bf16 %v224_v21, %v221_v14  ;;  %v578_v26 = vpop.f32.mrf.mxu0  ;;  %v586_v27 = vpop.f32.mrf.mxu1  ;;  %v413_v60 = vmul.f32 %v224_v21, %v224_v21 }
  0xd7   :  { %512 = vst [vmem:[%s695_s2] sm:$0xff] %v511_v22   ;;  %v384_v29 = vadd.f32 %v574_v11, %v383_v23  ;;  %v420_v30 = vadd.f32 %v405_v24, %v404_v19  ;;  %v410_v50 = vmul.f32 %v578_v26, %v578_v26  ;;  %v418_v10 = vmul.f32 %v586_v27, %v586_v27 }
  0xd8   :  { %551 = vst [vmem:[%s695_s2 + $0x20] sm:$0xff] %v531_v25   ;;  %v205_v31 = vpop.f32.mrf.mxu0  ;;  %v237_v32 = vpop.f32.mrf.mxu1 }
  0xd9   :  { %v421_v34 = vadd.f32 %v420_v30, %v406_v28  ;;  %v385_v35 = vadd.f32 %v575_v15, %v384_v29  ;;  %v408_v39 = vmul.f32 %v205_v31, %v205_v31  ;;  %v416_v5 = vmul.f32 %v237_v32, %v237_v32 }
  0xda   :  { %v579_v36 = vpop.f32.mrf.mxu0  ;;  %v587_v37 = vpop.f32.mrf.mxu1 }
  0xdb   :  { %v386_v38 = vadd.f32 %v385_v35, %v205_v31  ;;  %v422_v40 = vadd.f32 %v421_v34, %v407_v33  ;;  %v526_v41 = vpack.c.bf16 %v579_v36, %v578_v26  ;;  %v546_v43 = vpack.c.bf16 %v587_v37, %v586_v27 }
  0xdc   :  { %v208_v42 = vpop.f32.mrf.mxu0  ;;  %v240_v44 = vpop.f32.mrf.mxu1  ;;  %v411_v53 = vmul.f32 %v579_v36, %v579_v36  ;;  %v419_v15 = vmul.f32 %v587_v37, %v587_v37 }
  0xdd   :  { %v423_v45 = vadd.f32 %v422_v40, %v408_v39  ;;  %550 = vst [vmem:[%s695_s2 + $0x18] sm:$0xff] %v526_v41   ;;  %v521_v46 = vpack.c.bf16 %v208_v42, %v205_v31  ;;  %v387_v47 = vadd.f32 %v386_v38, %v208_v42  ;;  %v409_v48 = vmul.f32 %v208_v42, %v208_v42 }
  0xde   :  { %554 = vst [vmem:[%s695_s2 + $0x38] sm:$0xff] %v546_v43   ;;  %v541_v49 = vpack.c.bf16 %v240_v44, %v237_v32  ;;  %v417_v9 = vmul.f32 %v240_v44, %v240_v44 }
  0xdf   :  { %549 = vst [vmem:[%s695_s2 + $0x10] sm:$0xff] %v521_v46   ;;  %v388_v51 = vadd.f32 %v578_v26, %v387_v47  ;;  %v424_v52 = vadd.f32 %v423_v45, %v409_v48 }
  0xe0   :  { %553 = vst [vmem:[%s695_s2 + $0x30] sm:$0xff] %v541_v49  }
  0xe1   :  { %v389_v54 = vadd.f32 %v579_v36, %v388_v51  ;;  %v425_v55 = vadd.f32 %v424_v52, %v410_v50 }
  0xe3   :  { %v426_v57 = vadd.f32 %v425_v55, %v411_v53  ;;  %v390_v58 = vadd.f32 %v389_v54, %v221_v14 }
  0xe5   :  { %v391_v59 = vadd.f32 %v390_v58, %v224_v21  ;;  %v427_v61 = vadd.f32 %v426_v57, %v412_v56  ;;  %v441_v21 = vlaneseq }
  0xe7   :  { %v392_v63 = vadd.f32 %v582_v12, %v391_v59  ;;  %v428_v0 = vadd.f32 %v427_v61, %v413_v60  ;;  %v442_v25 = vshrl.u32 %v441_v21, 7 }
  0xe9   :  { %v429_v2 = vadd.f32 %v428_v0, %v414_v62  ;;  %v393_v3 = vadd.f32 %v583_v16, %v392_v63  ;;  %vm443_vm1 = vcmp.eq.s32.totalorder %v442_v25, 0  ;;  %vm445_vm2 = vcmp.eq.s32.totalorder %v442_v25, 1 }
  0xeb   :  { %v394_v4 = vadd.f32 %v393_v3, %v237_v32  ;;  %v430_v6 = vadd.f32 %v429_v2, %v415_v1 }
  0xed   :  { %v431_v7 = vadd.f32 %v430_v6, %v416_v5  ;;  %v395_v8 = vadd.f32 %v394_v4, %v240_v44 }
  0xef   :  { %v396_v11 = vadd.f32 %v586_v27, %v395_v8  ;;  %v432_v13 = vadd.f32 %v431_v7, %v417_v9 }
  0xf1   :  { %v397_v14 = vadd.f32 %v587_v37, %v396_v11  ;;  %v433_v17 = vadd.f32 %v432_v13, %v418_v10 }
  0xf3   :  { %v398_v18 = vrot.slane %v397_v14, 4  ;;  %v434_v19 = vadd.f32 %v433_v17, %v419_v15 }
  0xf5   :  { %v399_v20 = vadd.f32 %v398_v18, %v397_v14  ;;  %v435_v12 = vrot.slane %v434_v19, 4 }
  0xf7   :  { %v400_v22 = vrot.slane %v399_v20, 2  ;;  %v436_v23 = vadd.f32 %v435_v12, %v434_v19 }
  0xf9   :  { %v401_v16 = vadd.f32 %v400_v22, %v399_v20  ;;  %v437_v24 = vrot.slane %v436_v23, 2 }
  0xfb   :  { %v402_v26 = vrot.slane %v401_v16, 1  ;;  %v438_v28 = vadd.f32 %v437_v24, %v436_v23 }
  0xfd   :  { %v403_v29 = vadd.f32 %v402_v26, %v401_v16  ;;  %v439_v30 = vrot.slane %v438_v28, 1 }
  0xff   :  { %v440_v27 = vadd.f32 %v439_v30, %v438_v28  ;;  %v444_v31 = vsel %vm443_vm1, %v403_v29, 0.0 }
 0x101   :  { %v446_v32 = vsel %vm445_vm2, %v440_v27, 0.0 }
 0x102   :  { %v447_v33 = vadd.f32 %v446_v32, %v444_v31 }
 0x104   :  { %448 = vst [vmem:[%s696_s3] sm:$0xff] %v447_v33 }

// kernel: resnet_bottleneck_forward.14
= control target key start
LH: loop header
LB: loop body
LE: loop exit
PB: predicated region body
PF: predicated region fallthrough
CT: control target
= control target key end

     0   :  { %vm114_vm0 = vcmask 130048   ;;  %s657_s1 = inlined_call_operand.vmem [shape: bf16[16,128], index: 1, kind: input, shape index: {}]   ;;  %s658_s0 = inlined_call_operand.vmem [shape: bf16[128,16], index: 0, kind: input, shape index: {}]   ;;  %s659_s2 = inlined_call_operand.vmem [shape: bf16[128,128], index: 2, kind: output, shape index: {0}]   ;;  %s660_s3 = inlined_call_operand.vmem [shape: f32[1,8,128], index: 3, kind: output, shape index: {1}]  }
   0x1   :  { %v566_v0 = vld [vmem:[%s657_s1] sm:$0xff]   ;;  %v568_v2 = vld [vmem:[%s658_s0 + $0x8] sm:$0xff]   ;;  %v569_v3 = vld [vmem:[%s658_s0 + $0x10] sm:$0xff]  }
   0x2   :  { %v567_v1 = vld [vmem:[%s658_s0] sm:$0xff]   ;;  %546 = vmatprep.subr.bf16.mxu0 %v566_v0  ;;  %564 = vmatprep.subr.bf16.mxu1 %v566_v0  ;;  %v572_v5 = vld [vmem:[%s658_s0 + $0x28] sm:$0xff]   ;;  %v573_v6 = vld [vmem:[%s658_s0 + $0x30] sm:$0xff]  }
   0x3   :  { %547 = vmatpush3.bf16.msra.mxu0 %v566_v0  ;;  %548 = vmatprep.mubr.msk.bf16.mxu0 %vm114_vm0, %v567_v1  ;;  %v571_v4 = vld [vmem:[%s658_s0 + $0x20] sm:$0xff]   ;;  %v570_v7 = vld [vmem:[%s658_s0 + $0x18] sm:$0xff]  }
   0x4   :  { %565 = vmatpush3.bf16.msra.mxu1 %v566_v0  ;;  %556 = vmatprep.mubr.msk.bf16.mxu1 %vm114_vm0, %v571_v4  ;;  %v574_v8 = vld [vmem:[%s658_s0 + $0x38] sm:$0xff]  }
   0x6   :  { %549 = vmatmul.mubr.msk.bf16.vlgmr.msra.gmra.mxu0 %vm114_vm0, %v568_v2 }
   0x7   :  { %552 = vmatprep.mubr.msk.bf16.mxu0 %vm114_vm0, %v569_v3  ;;  %557 = vmatmul.mubr.msk.bf16.vlgmr.msra.gmra.mxu1 %vm114_vm0, %v572_v5 }
   0x8   :  { %560 = vmatprep.mubr.msk.bf16.mxu1 %vm114_vm0, %v573_v6 }
   0xe   :  { %553 = vmatmul.mubr.msk.bf16.gmra.mxu0 %vm114_vm0, %v570_v7 }
   0xf   :  { %561 = vmatmul.mubr.msk.bf16.gmra.mxu1 %vm114_vm0, %v574_v8 }
  0xc6   :  { %v550_v9 = vpop.f32.mrf.mxu0 }
  0xc7   :  { %v558_v11 = vpop.f32.mrf.mxu1  ;;  %v390_v24 = vmul.f32 %v550_v9, %v550_v9 }
  0xc8   :  { %v173_v10 = vpop.f32.mrf.mxu0  ;;  %v398_v60 = vmul.f32 %v558_v11, %v558_v11 }
  0xc9   :  { %v205_v13 = vpop.f32.mrf.mxu1  ;;  %v388_v15 = vmul.f32 %v173_v10, %v173_v10 }
  0xca   :  { %v551_v12 = vpop.f32.mrf.mxu0  ;;  %v396_v54 = vmul.f32 %v205_v13, %v205_v13 }
  0xcb   :  { %v498_v14 = vpack.c.bf16 %v551_v12, %v550_v9  ;;  %v559_v17 = vpop.f32.mrf.mxu1  ;;  %v391_v30 = vmul.f32 %v551_v12, %v551_v12 }
  0xcc   :  { %v176_v16 = vpop.f32.mrf.mxu0  ;;  %v518_v21 = vpack.c.bf16 %v559_v17, %v558_v11  ;;  %v399_v63 = vmul.f32 %v559_v17, %v559_v17 }
  0xcd   :  { %530 = vst [vmem:[%s659_s2 + $0x8] sm:$0xff] %v498_v14   ;;  %v493_v18 = vpack.c.bf16 %v176_v16, %v173_v10  ;;  %v367_v19 = vadd.f32 %v176_v16, %v173_v10  ;;  %v389_v20 = vmul.f32 %v176_v16, %v176_v16  ;;  %v208_v23 = vpop.f32.mrf.mxu1 }
  0xce   :  { %v554_v22 = vpop.f32.mrf.mxu0  ;;  %534 = vst [vmem:[%s659_s2 + $0x28] sm:$0xff] %v518_v21   ;;  %v513_v27 = vpack.c.bf16 %v208_v23, %v205_v13  ;;  %v397_v58 = vmul.f32 %v208_v23, %v208_v23 }
  0xcf   :  { %494 = vst [vmem:[%s659_s2] sm:$0xff] %v493_v18   ;;  %v368_v25 = vadd.f32 %v550_v9, %v367_v19  ;;  %v404_v26 = vadd.f32 %v389_v20, %v388_v15  ;;  %v562_v29 = vpop.f32.mrf.mxu1  ;;  %v394_v47 = vmul.f32 %v554_v22, %v554_v22  ;;  %v425_v19 = vlaneseq }
  0xd0   :  { %v189_v28 = vpop.f32.mrf.mxu0  ;;  %533 = vst [vmem:[%s659_s2 + $0x20] sm:$0xff] %v513_v27   ;;  %v402_v8 = vmul.f32 %v562_v29, %v562_v29 }
  0xd1   :  { %v405_v31 = vadd.f32 %v404_v26, %v390_v24  ;;  %v369_v32 = vadd.f32 %v551_v12, %v368_v25  ;;  %v221_v34 = vpop.f32.mrf.mxu1  ;;  %v392_v36 = vmul.f32 %v189_v28, %v189_v28 }
  0xd2   :  { %v555_v33 = vpop.f32.mrf.mxu0  ;;  %v400_v3 = vmul.f32 %v221_v34, %v221_v34 }
  0xd3   :  { %v370_v35 = vadd.f32 %v369_v32, %v189_v28  ;;  %v406_v37 = vadd.f32 %v405_v31, %v391_v30  ;;  %v508_v38 = vpack.c.bf16 %v555_v33, %v554_v22  ;;  %v563_v40 = vpop.f32.mrf.mxu1  ;;  %v395_v51 = vmul.f32 %v555_v33, %v555_v33 }
  0xd4   :  { %v192_v39 = vpop.f32.mrf.mxu0  ;;  %v528_v45 = vpack.c.bf16 %v563_v40, %v562_v29  ;;  %v403_v12 = vmul.f32 %v563_v40, %v563_v40 }
  0xd5   :  { %v407_v41 = vadd.f32 %v406_v37, %v392_v36  ;;  %532 = vst [vmem:[%s659_s2 + $0x18] sm:$0xff] %v508_v38   ;;  %v503_v42 = vpack.c.bf16 %v192_v39, %v189_v28  ;;  %v371_v43 = vadd.f32 %v370_v35, %v192_v39  ;;  %v393_v44 = vmul.f32 %v192_v39, %v192_v39  ;;  %v224_v46 = vpop.f32.mrf.mxu1 }
  0xd6   :  { %v523_v50 = vpack.c.bf16 %v224_v46, %v221_v34  ;;  %536 = vst [vmem:[%s659_s2 + $0x38] sm:$0xff] %v528_v45   ;;  %v401_v7 = vmul.f32 %v224_v46, %v224_v46 }
  0xd7   :  { %531 = vst [vmem:[%s659_s2 + $0x10] sm:$0xff] %v503_v42   ;;  %v372_v48 = vadd.f32 %v554_v22, %v371_v43  ;;  %v408_v49 = vadd.f32 %v407_v41, %v393_v44 }
  0xd8   :  { %535 = vst [vmem:[%s659_s2 + $0x30] sm:$0xff] %v523_v50  }
  0xd9   :  { %v373_v52 = vadd.f32 %v555_v33, %v372_v48  ;;  %v409_v53 = vadd.f32 %v408_v49, %v394_v47 }
  0xdb   :  { %v410_v55 = vadd.f32 %v409_v53, %v395_v51  ;;  %v374_v56 = vadd.f32 %v373_v52, %v205_v13 }
  0xdd   :  { %v375_v57 = vadd.f32 %v374_v56, %v208_v23  ;;  %v411_v59 = vadd.f32 %v410_v55, %v396_v54  ;;  %v426_v23 = vshrl.u32 %v425_v19, 7 }
  0xdf   :  { %v376_v61 = vadd.f32 %v558_v11, %v375_v57  ;;  %v412_v62 = vadd.f32 %v411_v59, %v397_v58  ;;  %vm427_vm1 = vcmp.eq.s32.totalorder %v426_v23, 0  ;;  %vm429_vm2 = vcmp.eq.s32.totalorder %v426_v23, 1 }
  0xe1   :  { %v413_v0 = vadd.f32 %v412_v62, %v398_v60  ;;  %v377_v1 = vadd.f32 %v559_v17, %v376_v61 }
  0xe3   :  { %v378_v2 = vadd.f32 %v377_v1, %v221_v34  ;;  %v414_v4 = vadd.f32 %v413_v0, %v399_v63 }
  0xe5   :  { %v415_v5 = vadd.f32 %v414_v4, %v400_v3  ;;  %v379_v6 = vadd.f32 %v378_v2, %v224_v46 }
  0xe7   :  { %v380_v9 = vadd.f32 %v562_v29, %v379_v6  ;;  %v416_v10 = vadd.f32 %v415_v5, %v401_v7 }
  0xe9   :  { %v381_v13 = vadd.f32 %v563_v40, %v380_v9  ;;  %v417_v14 = vadd.f32 %v416_v10, %v402_v8 }
  0xeb   :  { %v382_v15 = vrot.slane %v381_v13, 4  ;;  %v418_v16 = vadd.f32 %v417_v14, %v403_v12 }
  0xed   :  { %v383_v18 = vadd.f32 %v382_v15, %v381_v13  ;;  %v419_v11 = vrot.slane %v418_v16, 4 }
  0xef   :  { %v384_v20 = vrot.slane %v383_v18, 2  ;;  %v420_v21 = vadd.f32 %v419_v11, %v418_v16 }
  0xf1   :  { %v385_v17 = vadd.f32 %v384_v20, %v383_v18  ;;  %v421_v22 = vrot.slane %v420_v21, 2 }
  0xf3   :  { %v386_v24 = vrot.slane %v385_v17, 1  ;;  %v422_v25 = vadd.f32 %v421_v22, %v420_v21 }
  0xf5   :  { %v387_v26 = vadd.f32 %v386_v24, %v385_v17  ;;  %v423_v27 = vrot.slane %v422_v25, 1 }
  0xf7   :  { %v424_v28 = vadd.f32 %v423_v27, %v422_v25  ;;  %v428_v29 = vsel %vm427_vm1, %v387_v26, 0.0 }
  0xf9   :  { %v430_v30 = vsel %vm429_vm2, %v424_v28, 0.0 }
  0xfa   :  { %v431_v31 = vadd.f32 %v430_v30, %v428_v29 }
  0xfc   :  { %432 = vst [vmem:[%s660_s3] sm:$0xff] %v431_v31 }

// kernel: resnet_bottleneck_forward.9
= control target key start
LH: loop header
LB: loop body
LE: loop exit
PB: predicated region body
PF: predicated region fallthrough
CT: control target
= control target key end

     0   :  { %s303_s0 = inlined_call_operand.vmem [shape: bf16[128,128], index: 0, kind: input, shape index: {}]   ;;  %s304_s1 = inlined_call_operand.vmem [shape: f32[1,128], index: 1, kind: input, shape index: {}]   ;;  %s305_s2 = inlined_call_operand.vmem [shape: f32[1,128], index: 2, kind: input, shape index: {}]   ;;  %s306_s3 = inlined_call_operand.vmem [shape: f32[128,128], index: 3, kind: output, shape index: {}]  }
   0x1   :  { %v131_v0 = vld [vmem:[%s303_s0] sm:$0xff]   ;;  %v162_v4 = vld [vmem:[%s303_s0 + $0x8] sm:$0xff]   ;;  %v163_v5 = vld [vmem:[%s303_s0 + $0x10] sm:$0xff]  }
   0x2   :  { %v195_v1 = vld [vmem:[%s304_s1] ss:$0 sm:$0xff]  ;;  %v132_v2 = vunpack.c.l.bf16 %v131_v0  ;;  %v133_v3 = vunpack.c.h.bf16 %v131_v0  ;;  %v164_v6 = vld [vmem:[%s303_s0 + $0x18] sm:$0xff]   ;;  %v136_v8 = vunpack.c.l.bf16 %v162_v4  ;;  %v137_v9 = vunpack.c.h.bf16 %v162_v4  ;;  %v166_v33 = vld [vmem:[%s303_s0 + $0x28] sm:$0xff]  }
   0x3   :  { %v209_v7 = vld [vmem:[%s305_s2] ss:$0 sm:$0xff]  ;;  %v140_v10 = vunpack.c.l.bf16 %v163_v5  ;;  %v141_v11 = vunpack.c.h.bf16 %v163_v5  ;;  %v144_v14 = vunpack.c.l.bf16 %v164_v6  ;;  %v145_v15 = vunpack.c.h.bf16 %v164_v6  ;;  %v167_v34 = vld [vmem:[%s303_s0 + $0x30] sm:$0xff]   ;;  %v168_v39 = vld [vmem:[%s303_s0 + $0x38] sm:$0xff]  }
   0x4   :  { %v53_v12 = vmul.f32 %v132_v2, %v195_v1  ;;  %v54_v13 = vmul.f32 %v133_v3, %v195_v1  ;;  %v55_v16 = vmul.f32 %v136_v8, %v195_v1  ;;  %v56_v17 = vmul.f32 %v137_v9, %v195_v1  ;;  %v165_v28 = vld [vmem:[%s303_s0 + $0x20] sm:$0xff]  }
   0x5   :  { %v57_v18 = vmul.f32 %v140_v10, %v195_v1  ;;  %v58_v19 = vmul.f32 %v141_v11, %v195_v1  ;;  %v59_v22 = vmul.f32 %v144_v14, %v195_v1  ;;  %v60_v23 = vmul.f32 %v145_v15, %v195_v1 }
   0x6   :  { %v76_v20 = vadd.f32 %v209_v7, %v53_v12  ;;  %v77_v21 = vadd.f32 %v209_v7, %v54_v13  ;;  %v78_v24 = vadd.f32 %v209_v7, %v55_v16  ;;  %v79_v25 = vadd.f32 %v209_v7, %v56_v17 }
   0x7   :  { %v80_v26 = vadd.f32 %v209_v7, %v57_v18  ;;  %v81_v27 = vadd.f32 %v209_v7, %v58_v19  ;;  %v82_v31 = vadd.f32 %v209_v7, %v59_v22  ;;  %v83_v32 = vadd.f32 %v209_v7, %v60_v23 }
   0x8   :  { %v92_v29 = vmax.f32 %v76_v20, 0.0  ;;  %v93_v30 = vmax.f32 %v77_v21, 0.0  ;;  %v94_v35 = vmax.f32 %v78_v24, 0.0  ;;  %v95_v36 = vmax.f32 %v79_v25, 0.0 }
   0x9   :  { %v96_v37 = vmax.f32 %v80_v26, 0.0  ;;  %v97_v38 = vmax.f32 %v81_v27, 0.0  ;;  %v98_v40 = vmax.f32 %v82_v31, 0.0  ;;  %v99_v41 = vmax.f32 %v83_v32, 0.0 }
   0xa   :  { %108 = vst [vmem:[%s306_s3] sm:$0xff] %v92_v29  ;;  %109 = vst [vmem:[%s306_s3 + $0x8] sm:$0xff] %v93_v30  ;;  %v148_v42 = vunpack.c.l.bf16 %v165_v28  ;;  %v149_v43 = vunpack.c.h.bf16 %v165_v28  ;;  %v152_v44 = vunpack.c.l.bf16 %v166_v33  ;;  %v153_v45 = vunpack.c.h.bf16 %v166_v33 }
   0xb   :  { %110 = vst [vmem:[%s306_s3 + $0x10] sm:$0xff] %v94_v35  ;;  %111 = vst [vmem:[%s306_s3 + $0x18] sm:$0xff] %v95_v36  ;;  %v156_v46 = vunpack.c.l.bf16 %v167_v34  ;;  %v157_v47 = vunpack.c.h.bf16 %v167_v34  ;;  %v160_v50 = vunpack.c.l.bf16 %v168_v39  ;;  %v161_v51 = vunpack.c.h.bf16 %v168_v39 }
   0xc   :  { %112 = vst [vmem:[%s306_s3 + $0x20] sm:$0xff] %v96_v37  ;;  %113 = vst [vmem:[%s306_s3 + $0x28] sm:$0xff] %v97_v38  ;;  %v61_v48 = vmul.f32 %v148_v42, %v195_v1  ;;  %v62_v49 = vmul.f32 %v149_v43, %v195_v1  ;;  %v63_v52 = vmul.f32 %v152_v44, %v195_v1 }
   0xd   :  { %114 = vst [vmem:[%s306_s3 + $0x30] sm:$0xff] %v98_v40  ;;  %115 = vst [vmem:[%s306_s3 + $0x38] sm:$0xff] %v99_v41  ;;  %v64_v53 = vmul.f32 %v153_v45, %v195_v1  ;;  %v65_v54 = vmul.f32 %v156_v46, %v195_v1  ;;  %v66_v55 = vmul.f32 %v157_v47, %v195_v1 }
   0xe   :  { %v84_v56 = vadd.f32 %v209_v7, %v61_v48  ;;  %v85_v57 = vadd.f32 %v209_v7, %v62_v49  ;;  %v67_v58 = vmul.f32 %v160_v50, %v195_v1  ;;  %v68_v59 = vmul.f32 %v161_v51, %v195_v1 }
   0xf   :  { %v86_v60 = vadd.f32 %v209_v7, %v63_v52  ;;  %v87_v61 = vadd.f32 %v209_v7, %v64_v53  ;;  %v88_v62 = vadd.f32 %v209_v7, %v65_v54  ;;  %v89_v63 = vadd.f32 %v209_v7, %v66_v55 }
  0x10   :  { %v100_v0 = vmax.f32 %v84_v56, 0.0  ;;  %v101_v2 = vmax.f32 %v85_v57, 0.0  ;;  %v90_v3 = vadd.f32 %v209_v7, %v67_v58  ;;  %v91_v4 = vadd.f32 %v209_v7, %v68_v59 }
  0x11   :  { %v102_v5 = vmax.f32 %v86_v60, 0.0  ;;  %v103_v6 = vmax.f32 %v87_v61, 0.0  ;;  %v104_v8 = vmax.f32 %v88_v62, 0.0  ;;  %v105_v9 = vmax.f32 %v89_v63, 0.0 }
  0x12   :  { %116 = vst [vmem:[%s306_s3 + $0x40] sm:$0xff] %v100_v0  ;;  %117 = vst [vmem:[%s306_s3 + $0x48] sm:$0xff] %v101_v2  ;;  %v106_v1 = vmax.f32 %v90_v3, 0.0  ;;  %v107_v10 = vmax.f32 %v91_v4, 0.0 }
  0x13   :  { %118 = vst [vmem:[%s306_s3 + $0x50] sm:$0xff] %v102_v5  ;;  %119 = vst [vmem:[%s306_s3 + $0x58] sm:$0xff] %v103_v6 }
  0x14   :  { %120 = vst [vmem:[%s306_s3 + $0x60] sm:$0xff] %v104_v8  ;;  %121 = vst [vmem:[%s306_s3 + $0x68] sm:$0xff] %v105_v9 }
  0x15   :  { %122 = vst [vmem:[%s306_s3 + $0x70] sm:$0xff] %v106_v1  ;;  %123 = vst [vmem:[%s306_s3 + $0x78] sm:$0xff] %v107_v10 }

// kernel: resnet_bottleneck_forward.15
= control target key start
LH: loop header
LB: loop body
LE: loop exit
PB: predicated region body
PF: predicated region fallthrough
CT: control target
= control target key end

     0   :  { %s387_s0 = inlined_call_operand.vmem [shape: bf16[128,128], index: 0, kind: input, shape index: {}]   ;;  %s388_s1 = inlined_call_operand.vmem [shape: f32[1,128], index: 1, kind: input, shape index: {}]   ;;  %s389_s2 = inlined_call_operand.vmem [shape: f32[1,128], index: 2, kind: input, shape index: {}]   ;;  %s390_s3 = inlined_call_operand.vmem [shape: f32[128,128], index: 3, kind: input, shape index: {}]   ;;  %s391_s4 = inlined_call_operand.hbm [shape: f32[128,128], index: 4, kind: output, shape index: {}]  }
   0x1   :  { %v179_v0 = vld [vmem:[%s387_s0] sm:$0xff]   ;;  %v210_v4 = vld [vmem:[%s387_s0 + $0x8] sm:$0xff]   ;;  %v211_v8 = vld [vmem:[%s387_s0 + $0x10] sm:$0xff]  }
   0x2   :  { %v276_v1 = vld [vmem:[%s388_s1] ss:$0 sm:$0xff]  ;;  %v180_v2 = vunpack.c.l.bf16 %v179_v0  ;;  %v181_v3 = vunpack.c.h.bf16 %v179_v0  ;;  %v184_v6 = vunpack.c.l.bf16 %v210_v4  ;;  %v185_v7 = vunpack.c.h.bf16 %v210_v4  ;;  %v212_v13 = vld [vmem:[%s387_s0 + $0x18] sm:$0xff]   ;;  %v113_v23 = vld [vmem:[%s390_s3 + $0x8] sm:$0xff] }
   0x3   :  { %v284_v5 = vld [vmem:[%s389_s2] ss:$0 sm:$0xff]  ;;  %v188_v11 = vunpack.c.l.bf16 %v211_v8  ;;  %v189_v12 = vunpack.c.h.bf16 %v211_v8  ;;  %v192_v16 = vunpack.c.l.bf16 %v212_v13  ;;  %v193_v17 = vunpack.c.h.bf16 %v212_v13  ;;  %v114_v30 = vld [vmem:[%s390_s3 + $0x10] sm:$0xff]  ;;  %v115_v31 = vld [vmem:[%s390_s3 + $0x18] sm:$0xff] }
   0x4   :  { %v57_v9 = vmul.f32 %v180_v2, %v276_v1  ;;  %v58_v10 = vmul.f32 %v181_v3, %v276_v1  ;;  %v59_v14 = vmul.f32 %v184_v6, %v276_v1  ;;  %v60_v15 = vmul.f32 %v185_v7, %v276_v1  ;;  %v112_v22 = vld [vmem:[%s390_s3] sm:$0xff]  ;;  %v117_v37 = vld [vmem:[%s390_s3 + $0x28] sm:$0xff] }
   0x5   :  { %v61_v20 = vmul.f32 %v188_v11, %v276_v1  ;;  %v62_v21 = vmul.f32 %v189_v12, %v276_v1  ;;  %v63_v26 = vmul.f32 %v192_v16, %v276_v1  ;;  %v64_v27 = vmul.f32 %v193_v17, %v276_v1  ;;  %v116_v33 = vld [vmem:[%s390_s3 + $0x20] sm:$0xff] }
   0x6   :  { %v80_v18 = vadd.f32 %v284_v5, %v57_v9  ;;  %v81_v19 = vadd.f32 %v284_v5, %v58_v10  ;;  %v82_v24 = vadd.f32 %v284_v5, %v59_v14  ;;  %v83_v25 = vadd.f32 %v284_v5, %v60_v15  ;;  %v213_v40 = vld [vmem:[%s387_s0 + $0x20] sm:$0xff]  }
   0x7   :  { %v84_v32 = vadd.f32 %v284_v5, %v61_v20  ;;  %v85_v34 = vadd.f32 %v284_v5, %v62_v21  ;;  %v86_v38 = vadd.f32 %v284_v5, %v63_v26  ;;  %v87_v39 = vadd.f32 %v284_v5, %v64_v27 }
   0x8   :  { %v96_v28 = vmax.f32 %v80_v18, 0.0  ;;  %v97_v29 = vmax.f32 %v81_v19, 0.0  ;;  %v98_v35 = vmax.f32 %v82_v24, 0.0  ;;  %v99_v36 = vmax.f32 %v83_v25, 0.0 }
   0x9   :  { %9 = vsyncpa [#allocation3], 0  ;;  %v100_v43 = vmax.f32 %v84_v32, 0.0  ;;  %v101_v44 = vmax.f32 %v85_v34, 0.0  ;;  %v118_v45 = vld [vmem:[%s390_s3 + $0x30] sm:$0xff]  ;;  %v119_v46 = vld [vmem:[%s390_s3 + $0x38] sm:$0xff]  ;;  %v196_v55 = vunpack.c.l.bf16 %v213_v40  ;;  %v197_v56 = vunpack.c.h.bf16 %v213_v40 }
   0xa   :  { %v128_v41 = vadd.f32 %v112_v22, %v96_v28  ;;  %v129_v42 = vadd.f32 %v113_v23, %v97_v29  ;;  %v214_v47 = vld [vmem:[%s387_s0 + $0x28] sm:$0xff]   ;;  %v130_v48 = vadd.f32 %v114_v30, %v98_v35  ;;  %v131_v49 = vadd.f32 %v115_v31, %v99_v36  ;;  %v215_v52 = vld [vmem:[%s387_s0 + $0x30] sm:$0xff]   ;;  %v216_v57 = vld [vmem:[%s387_s0 + $0x38] sm:$0xff]   ;;  %s242_s10 = smov [#allocation2]  }
   0xb   :  { %v102_v50 = vmax.f32 %v86_v38, 0.0  ;;  %v103_v51 = vmax.f32 %v87_v39, 0.0  ;;  %v132_v53 = vadd.f32 %v116_v33, %v100_v43  ;;  %v133_v54 = vadd.f32 %v117_v37, %v101_v44  ;;  %v120_v12 = vld [vmem:[%s390_s3 + $0x40] sm:$0xff]  ;;  %v121_v13 = vld [vmem:[%s390_s3 + $0x48] sm:$0xff]  ;;  %v122_v20 = vld [vmem:[%s390_s3 + $0x50] sm:$0xff]  ;;  %s165_s11 = sshll.u32 %s242_s10, 4  ;;  %s166_s11 = int_to_ptr.vmem [resolvable:$true] %s165_s11 }
   0xc   :  { %144 = vst [vmem:[#allocation2] sm:$0xff] %v128_v41  ;;  %145 = vst [vmem:[#allocation2 + $0x8] sm:$0xff] %v129_v42  ;;  %v200_v60 = vunpack.c.l.bf16 %v214_v47  ;;  %v201_v61 = vunpack.c.h.bf16 %v214_v47  ;;  %v65_v62 = vmul.f32 %v196_v55, %v276_v1  ;;  %v66_v63 = vmul.f32 %v197_v56, %v276_v1  ;;  %v123_v21 = vld [vmem:[%s390_s3 + $0x58] sm:$0xff]  ;;  %v125_v26 = vld [vmem:[%s390_s3 + $0x68] sm:$0xff]  ;;  %p225_p1 = scmp.lt.s32.totalorder %s166_s11, %s166_s11 }
   0xd   :  { %146 = vst [vmem:[#allocation2 + $0x10] sm:$0xff] %v130_v48  ;;  %147 = vst [vmem:[#allocation2 + $0x18] sm:$0xff] %v131_v49  ;;  %v134_v58 = vadd.f32 %v118_v45, %v102_v50  ;;  %v135_v59 = vadd.f32 %v119_v46, %v103_v51  ;;  %v204_v0 = vunpack.c.l.bf16 %v215_v52  ;;  %v205_v2 = vunpack.c.h.bf16 %v215_v52  ;;  %v126_v33 = vld [vmem:[%s390_s3 + $0x70] sm:$0xff]  ;;  %v127_v34 = vld [vmem:[%s390_s3 + $0x78] sm:$0xff] }
   0xe   :  { %148 = vst [vmem:[#allocation2 + $0x20] sm:$0xff] %v132_v53  ;;  %149 = vst [vmem:[#allocation2 + $0x28] sm:$0xff] %v133_v54  ;;  %v67_v3 = vmul.f32 %v200_v60, %v276_v1  ;;  %v68_v4 = vmul.f32 %v201_v61, %v276_v1  ;;  %v208_v6 = vunpack.c.l.bf16 %v216_v57  ;;  %v209_v7 = vunpack.c.h.bf16 %v216_v57 }
   0xf   :  { %150 = vst [vmem:[#allocation2 + $0x30] sm:$0xff] %v134_v58  ;;  %151 = vst [vmem:[#allocation2 + $0x38] sm:$0xff] %v135_v59  ;;  %v88_v8 = vadd.f32 %v284_v5, %v65_v62  ;;  %v89_v9 = vadd.f32 %v284_v5, %v66_v63  ;;  %v69_v10 = vmul.f32 %v204_v0, %v276_v1 }
  0x10   :  { %v70_v11 = vmul.f32 %v205_v2, %v276_v1  ;;  %v90_v14 = vadd.f32 %v284_v5, %v67_v3  ;;  %v91_v15 = vadd.f32 %v284_v5, %v68_v4  ;;  %v71_v16 = vmul.f32 %v208_v6, %v276_v1 }
  0x11   :  { %v72_v17 = vmul.f32 %v209_v7, %v276_v1  ;;  %v104_v18 = vmax.f32 %v88_v8, 0.0  ;;  %v105_v19 = vmax.f32 %v89_v9, 0.0  ;;  %v92_v22 = vadd.f32 %v284_v5, %v69_v10  ;;  %v124_v1 = vld [vmem:[%s390_s3 + $0x60] sm:$0xff]  ;;  %s220_s3 = scalar_lea.vmem %s166_s11, 2048 }
  0x12   :  { %v93_v23 = vadd.f32 %v284_v5, %v70_v11  ;;  %v106_v24 = vmax.f32 %v90_v14, 0.0  ;;  %v107_v25 = vmax.f32 %v91_v15, 0.0  ;;  %v94_v27 = vadd.f32 %v284_v5, %v71_v16  ;;  %p221_p0 = scmp.ne.s32.totalorder %s166_s11, %s220_s3  ;;  %p226_p2 = scmp.lt.s32.totalorder %s220_s3, %s220_s3 }
  0x13   :  { %v95_v28 = vadd.f32 %v284_v5, %v72_v17  ;;  %v136_v29 = vadd.f32 %v120_v12, %v104_v18  ;;  %v137_v30 = vadd.f32 %v121_v13, %v105_v19  ;;  %v108_v31 = vmax.f32 %v92_v22, 0.0 }
  0x14   :  { %v109_v32 = vmax.f32 %v93_v23, 0.0  ;;  %v138_v35 = vadd.f32 %v122_v20, %v106_v24  ;;  %v139_v36 = vadd.f32 %v123_v21, %v107_v25  ;;  %v110_v37 = vmax.f32 %v94_v27, 0.0  ;;  %p227_p3 = por %p226_p2, %p225_p1 }
  0x15   :  { %v111_v38 = vmax.f32 %v95_v28, 0.0  ;;  %152 = vst [vmem:[#allocation2 + $0x40] sm:$0xff] %v136_v29  ;;  %153 = vst [vmem:[#allocation2 + $0x48] sm:$0xff] %v137_v30  ;;  %v140_v5 = vadd.f32 %v124_v1, %v108_v31 }
  0x16   :  { %v141_v39 = vadd.f32 %v125_v26, %v109_v32  ;;  %154 = vst [vmem:[#allocation2 + $0x50] sm:$0xff] %v138_v35  ;;  %155 = vst [vmem:[#allocation2 + $0x58] sm:$0xff] %v139_v36  ;;  %v142_v40 = vadd.f32 %v126_v33, %v110_v37  ;;  %p228_p4 = pnand %p227_p3, %p221_p0 }
  0x17   :  { %v143_v41 = vadd.f32 %v127_v34, %v111_v38  ;;  %156 = vst [vmem:[#allocation2 + $0x60] sm:$0xff] %v140_v5 }
  0x18   :  { %157 = vst [vmem:[#allocation2 + $0x68] sm:$0xff] %v141_v39  ;;  %158 = vst [vmem:[#allocation2 + $0x70] sm:$0xff] %v142_v40 }
  0x19   :  { %159 = vst [vmem:[#allocation2 + $0x78] sm:$0xff] %v143_v41 }
  0x1a   :  { %231 = shalt.err (!%p228_p4)
}
  0x1b   :  { %s243_s12 = smov 128   ;;  %s244_s13 = smov 8  }
  0x1c   :  { %171 = dma.vmem_to_hbm [thread:$0]  %s166_s11, 2048, %s391_s4, [#allocation3], %s243_s12, %s243_s12, %s244_s13  }
  0x1d   :  { %240 = dma.done.wait [#allocation3], 2048  }
  0x1e   :  { %241 = vsyncadd [#allocation3], 4294965248 }
  0x1f   :  { %175 = vsyncpa [#allocation3], 1 }

</bundles_post_ra>
